<compile_context>
chip_gen: v7x
topology: tpu7x:2x2x1
jax: 0.10.0
libtpu: 0.0.40
codegen_flags: <defaults>
</compile_context>

<pallas_src>
import functools

import jax
import jax.numpy as jnp
from jax import lax
from jax.experimental import pallas as pl
from jax.experimental.pallas import tpu as pltpu


def _round_up(v, m):
    return ((v + m - 1) // m) * m


# --------------------------------------------------------------------------
# Pallas kernel: 3x3 conv (replicate padding) + bias [+ ReLU] [+ residual]
# --------------------------------------------------------------------------
def _conv3x3_kernel(x_ref, w_ref, b_ref, o_ref, *, wp, l_out, relu, add_residual):
    """x_ref: (1, Cin, Lin)   padded image flattened with row stride wp
       w_ref: (9, Cout, Cin)  tap-major weights (tap t = dy*3 + dx)
       b_ref: (Cout, 1)       bias (per-sublane constant)
       o_ref: (1, Cout, Lout) output flattened with row stride wp (lane-dense)
    """
    cout = o_ref.shape[1]
    acc = jnp.zeros((cout, l_out), jnp.float32)
    for dy in range(3):
        for dx in range(3):
            t = dy * 3 + dx
            off = dy * wp + dx
            xs = x_ref[0, :, off:off + l_out]                 # (Cin, Lout)
            acc = acc + jnp.dot(w_ref[t], xs,
                                preferred_element_type=jnp.float32)
    acc = acc + b_ref[...].astype(jnp.float32)                # bias epilogue
    if relu:
        acc = jnp.maximum(acc, 0.0)
    if add_residual:
        # Residual = the un-padded input itself (Cin == Cout here); element
        # (h, w) lives at flat offset (h+1)*wp + (w+1) = j + wp + 1.
        acc = acc + x_ref[0, :, wp + 1:wp + 1 + l_out].astype(jnp.float32)
    o_ref[0] = acc.astype(o_ref.dtype)


def conv3x3_pallas(x, weight, bias, *, relu=False, add_residual=False):
    """3x3 conv, stride 1, padding=1 with replicate padding, NCHW layout.

    x:      (N, Cin, H, W)
    weight: (Cout, Cin, 3, 3)   (PyTorch OIHW layout)
    bias:   (Cout,)
    Optionally fuses ReLU and a `+ x` residual (requires Cout == Cin).
    """
    n, cin, h, w = x.shape
    cout = weight.shape[0]
    if add_residual:
        assert cin == cout, "residual add requires Cin == Cout"

    wp = w + 2                                   # padded row stride
    l_out = _round_up(h * wp, 128)               # lane-dense output length
    l_in = _round_up(l_out + 2 * wp + 2, 128)    # covers max tap offset reads

    # Replicate pad then flatten the trailing spatial dims (free reshape).
    xp = jnp.pad(x, ((0, 0), (0, 0), (1, 1), (1, 1)), mode="edge")
    xf = xp.reshape(n, cin, (h + 2) * wp)
    xf = jnp.pad(xf, ((0, 0), (0, 0), (0, l_in - (h + 2) * wp)))

    w_taps = jnp.transpose(weight, (2, 3, 0, 1)).reshape(9, cout, cin)
    b_col = bias.reshape(cout, 1)

    kernel = functools.partial(_conv3x3_kernel, wp=wp, l_out=l_out,
                               relu=relu, add_residual=add_residual)

    of = pl.pallas_call(
        kernel,
        out_shape=jax.ShapeDtypeStruct((n, cout, l_out), x.dtype),
        grid_spec=pltpu.PrefetchScalarGridSpec(
            num_scalar_prefetch=0,
            grid=(n,),                                       # one image / step
            in_specs=[
                pl.BlockSpec((1, cin, l_in), lambda i: (i, 0, 0)),
                pl.BlockSpec((9, cout, cin), lambda i: (0, 0, 0)),  # resident
                pl.BlockSpec((cout, 1), lambda i: (0, 0)),          # resident
            ],
            out_specs=pl.BlockSpec((1, cout, l_out), lambda i: (i, 0, 0)),
        ),
        compiler_params=pltpu.CompilerParams(
            dimension_semantics=("parallel",),
            vmem_limit_bytes=32 * 1024 * 1024,
        ),
    )(xf, w_taps, b_col)

    # Drop the garbage padding columns / rounded tail (free slicing/reshape).
    return of[:, :, :h * wp].reshape(n, cout, h, wp)[:, :, :, :w]


# --------------------------------------------------------------------------
# Encoder glue (plain JAX): standardization, BN folding, max-pool
# --------------------------------------------------------------------------
def _fold_bn_into_conv(w, b, x, gamma, beta, eps=1e-5):
    """Fold training-mode BatchNorm2d (batch statistics) into the following
    replicate-padded conv:  conv(W, BN(x)) == conv(W * a, x) + const."""
    mu = jnp.mean(x, axis=(0, 2, 3))
    var = jnp.var(x, axis=(0, 2, 3))             # biased, like BN normalization
    a = gamma / jnp.sqrt(var + eps)
    c = beta - mu * a
    w_f = w * a[None, :, None, None]
    b_f = b + jnp.einsum("oihw,i->o", w, c)
    return w_f, b_f


def _maxpool2(x):
    n, c, h, w = x.shape
    x = x[:, :, :(h // 2) * 2, :(w // 2) * 2]
    return x.reshape(n, c, h // 2, 2, w // 2, 2).max(axis=(3, 5))


@jax.jit
def encoder_forward(x, params):
    # Per-sample, per-channel standardization (torch.std is unbiased, ddof=1).
    m = jnp.mean(x, axis=(2, 3), keepdims=True)
    s = jnp.std(x, axis=(2, 3), ddof=1, keepdims=True)
    x = (x - m) / s

    ftrs = []
    for p in params:
        w1f, b1f = _fold_bn_into_conv(p["w1"], p["b1"], x, p["gamma"], p["beta"])
        y = conv3x3_pallas(x, w1f, b1f, relu=True, add_residual=False)
        z = conv3x3_pallas(y, p["w2"], p["b2"], relu=True, add_residual=True)
        ftrs.append(z)
        x = _maxpool2(z)
    return ftrs


class EncoderPallas:
    """Mirror of the PyTorch Encoder module (training-mode BatchNorm)."""

    def __init__(self, chs=(4, 8, 16), key=jax.random.PRNGKey(0)):
        self.chs = chs
        self.params = []
        for i in range(len(chs) - 1):
            cin, cout = chs[i], chs[i + 1]
            key, k1, k2, k3, k4 = jax.random.split(key, 5)
            bnd1 = (1.0 / (cin * 9)) ** 0.5       # kaiming_uniform(a=sqrt(5)) bounds
            bnd2 = (1.0 / (cout * 9)) ** 0.5
            self.params.append(dict(
                w1=jax.random.uniform(k1, (cout, cin, 3, 3), jnp.float32, -bnd1, bnd1),
                b1=jax.random.uniform(k2, (cout,), jnp.float32, -bnd1, bnd1),
                w2=jax.random.uniform(k3, (cout, cout, 3, 3), jnp.float32, -bnd2, bnd2),
                b2=jax.random.uniform(k4, (cout,), jnp.float32, -bnd2, bnd2),
                gamma=jnp.ones((cin,), jnp.float32),   # BatchNorm2d defaults
                beta=jnp.zeros((cin,), jnp.float32),
            ))

    def __call__(self, x):
        return encoder_forward(x, self.params)


# --------------------------------------------------------------------------
# Pure-JAX reference for correctness checking
# --------------------------------------------------------------------------
def _conv3x3_ref(x, w, b):
    xp = jnp.pad(x, ((0, 0), (0, 0), (1, 1), (1, 1)), mode="edge")
    out = lax.conv_general_dilated(
        xp, w, window_strides=(1, 1), padding="VALID",
        dimension_numbers=("NCHW", "OIHW", "NCHW"))
    return out + b[None, :, None, None]


def encoder_reference(x, params, eps=1e-5):
    m = jnp.mean(x, axis=(2, 3), keepdims=True)
    s = jnp.std(x, axis=(2, 3), ddof=1, keepdims=True)
    x = (x - m) / s
    ftrs = []
    for p in params:
        mu = jnp.mean(x, axis=(0, 2, 3), keepdims=True)
        var = jnp.var(x, axis=(0, 2, 3), keepdims=True)
        xbn = (x - mu) / jnp.sqrt(var + eps)
        xbn = xbn * p["gamma"][None, :, None, None] + p["beta"][None, :, None, None]
        y = jnp.maximum(_conv3x3_ref(xbn, p["w1"], p["b1"]), 0.0)
        z = jnp.maximum(_conv3x3_ref(y, p["w2"], p["b2"]), 0.0) + y
        ftrs.append(z)
        x = _maxpool2(z)
    return ftrs


if __name__ == "__main__":
    key = jax.random.PRNGKey(0)
    kx, kp = jax.random.split(key)

    # Small shapes consistent with Encoder.forward: NCHW input, chs=(4, 8, 16).
    N, C, H, W = 2, 4, 16, 16
    x = jax.random.normal(kx, (N, C, H, W), jnp.float32)

    model = EncoderPallas(chs=(4, 8, 16), key=kp)
    ftrs = model(x)
    ftrs = jax.block_until_ready(ftrs)

    assert [tuple(f.shape) for f in ftrs] == [(N, 8, 16, 16), (N, 16, 8, 8)]

    ref = encoder_reference(x, model.params)
    for got, want in zip(ftrs, ref):
        err = float(jnp.max(jnp.abs(got - want)))
        assert jnp.allclose(got, want, atol=1e-3, rtol=1e-3), err

    print("KERNEL_OK")
</pallas_src>

<mosaic_0001>
module attributes {stable_mosaic.version = 11 : i64} {
  func.func @_conv3x3_kernel(%arg0: i32, %arg1: memref<1x4x512xf32, #tpu.memory_space<vmem>>, %arg2: memref<9x8x4xf32, #tpu.memory_space<vmem>>, %arg3: memref<8x1xf32, #tpu.memory_space<vmem>>, %arg4: memref<1x8x384xf32, #tpu.memory_space<vmem>>) attributes {dimension_semantics = [#tpu.dimension_semantics<parallel>], iteration_bounds = array<i64: 2>, scalar_prefetch = 0 : i64, scratch_operands = 0 : i64, tpu.core_type = #tpu.core_type<tc>, window_params = [{transform_indices = @transform_0, window_bounds = array<i64: 1, 4, 512>}, {pipeline_mode = #tpu.pipeline_mode<synchronous>, transform_indices = @transform_1, window_bounds = array<i64: 9, 8, 4>}, {pipeline_mode = #tpu.pipeline_mode<synchronous>, transform_indices = @transform_2, window_bounds = array<i64: 8, 1>}, {transform_indices = @transform_3, window_bounds = array<i64: 1, 8, 384>}]} {
    %cst = arith.constant 0.000000e+00 : f32
    %0 = vector.broadcast %cst : f32 to vector<8x384xf32>
    %c0 = arith.constant 0 : index
    %c0_0 = arith.constant 0 : index
    %c0_1 = arith.constant 0 : index
    %1 = vector.load %arg1[%c0, %c0_0, %c0_1] : memref<1x4x512xf32, #tpu.memory_space<vmem>>, vector<1x4x384xf32>
    %2 = vector.shape_cast %1 : vector<1x4x384xf32> to vector<4x384xf32>
    %c0_2 = arith.constant 0 : index
    %c0_3 = arith.constant 0 : index
    %c0_4 = arith.constant 0 : index
    %3 = vector.load %arg2[%c0_2, %c0_3, %c0_4] : memref<9x8x4xf32, #tpu.memory_space<vmem>>, vector<1x8x4xf32>
    %4 = vector.shape_cast %3 : vector<1x8x4xf32> to vector<8x4xf32>
    %cst_5 = arith.constant dense<0.000000e+00> : vector<8x384xf32>
    %5 = tpu.matmul %4, %2, %cst_5 {dimension_numbers = #tpu.dot_dimension_numbers<[1], [0], [0], [1], [0, 0, 1, 1], [], []>} : vector<8x4xf32>, vector<4x384xf32>, vector<8x384xf32> -> vector<8x384xf32>
    %6 = arith.addf %0, %5 : vector<8x384xf32>
    %c0_6 = arith.constant 0 : index
    %c0_7 = arith.constant 0 : index
    %c1 = arith.constant 1 : index
    %7 = vector.load %arg1[%c0_6, %c0_7, %c1] : memref<1x4x512xf32, #tpu.memory_space<vmem>>, vector<1x4x384xf32>
    %8 = vector.shape_cast %7 : vector<1x4x384xf32> to vector<4x384xf32>
    %c1_8 = arith.constant 1 : index
    %c0_9 = arith.constant 0 : index
    %c0_10 = arith.constant 0 : index
    %9 = vector.load %arg2[%c1_8, %c0_9, %c0_10] : memref<9x8x4xf32, #tpu.memory_space<vmem>>, vector<1x8x4xf32>
    %10 = vector.shape_cast %9 : vector<1x8x4xf32> to vector<8x4xf32>
    %cst_11 = arith.constant dense<0.000000e+00> : vector<8x384xf32>
    %11 = tpu.matmul %10, %8, %cst_11 {dimension_numbers = #tpu.dot_dimension_numbers<[1], [0], [0], [1], [0, 0, 1, 1], [], []>} : vector<8x4xf32>, vector<4x384xf32>, vector<8x384xf32> -> vector<8x384xf32>
    %12 = arith.addf %6, %11 : vector<8x384xf32>
    %c0_12 = arith.constant 0 : index
    %c0_13 = arith.constant 0 : index
    %c2 = arith.constant 2 : index
    %13 = vector.load %arg1[%c0_12, %c0_13, %c2] : memref<1x4x512xf32, #tpu.memory_space<vmem>>, vector<1x4x384xf32>
    %14 = vector.shape_cast %13 : vector<1x4x384xf32> to vector<4x384xf32>
    %c2_14 = arith.constant 2 : index
    %c0_15 = arith.constant 0 : index
    %c0_16 = arith.constant 0 : index
    %15 = vector.load %arg2[%c2_14, %c0_15, %c0_16] : memref<9x8x4xf32, #tpu.memory_space<vmem>>, vector<1x8x4xf32>
    %16 = vector.shape_cast %15 : vector<1x8x4xf32> to vector<8x4xf32>
    %cst_17 = arith.constant dense<0.000000e+00> : vector<8x384xf32>
    %17 = tpu.matmul %16, %14, %cst_17 {dimension_numbers = #tpu.dot_dimension_numbers<[1], [0], [0], [1], [0, 0, 1, 1], [], []>} : vector<8x4xf32>, vector<4x384xf32>, vector<8x384xf32> -> vector<8x384xf32>
    %18 = arith.addf %12, %17 : vector<8x384xf32>
    %c0_18 = arith.constant 0 : index
    %c0_19 = arith.constant 0 : index
    %c18 = arith.constant 18 : index
    %19 = vector.load %arg1[%c0_18, %c0_19, %c18] : memref<1x4x512xf32, #tpu.memory_space<vmem>>, vector<1x4x384xf32>
    %20 = vector.shape_cast %19 : vector<1x4x384xf32> to vector<4x384xf32>
    %c3 = arith.constant 3 : index
    %c0_20 = arith.constant 0 : index
    %c0_21 = arith.constant 0 : index
    %21 = vector.load %arg2[%c3, %c0_20, %c0_21] : memref<9x8x4xf32, #tpu.memory_space<vmem>>, vector<1x8x4xf32>
    %22 = vector.shape_cast %21 : vector<1x8x4xf32> to vector<8x4xf32>
    %cst_22 = arith.constant dense<0.000000e+00> : vector<8x384xf32>
    %23 = tpu.matmul %22, %20, %cst_22 {dimension_numbers = #tpu.dot_dimension_numbers<[1], [0], [0], [1], [0, 0, 1, 1], [], []>} : vector<8x4xf32>, vector<4x384xf32>, vector<8x384xf32> -> vector<8x384xf32>
    %24 = arith.addf %18, %23 : vector<8x384xf32>
    %c0_23 = arith.constant 0 : index
    %c0_24 = arith.constant 0 : index
    %c19 = arith.constant 19 : index
    %25 = vector.load %arg1[%c0_23, %c0_24, %c19] : memref<1x4x512xf32, #tpu.memory_space<vmem>>, vector<1x4x384xf32>
    %26 = vector.shape_cast %25 : vector<1x4x384xf32> to vector<4x384xf32>
    %c4 = arith.constant 4 : index
    %c0_25 = arith.constant 0 : index
    %c0_26 = arith.constant 0 : index
    %27 = vector.load %arg2[%c4, %c0_25, %c0_26] : memref<9x8x4xf32, #tpu.memory_space<vmem>>, vector<1x8x4xf32>
    %28 = vector.shape_cast %27 : vector<1x8x4xf32> to vector<8x4xf32>
    %cst_27 = arith.constant dense<0.000000e+00> : vector<8x384xf32>
    %29 = tpu.matmul %28, %26, %cst_27 {dimension_numbers = #tpu.dot_dimension_numbers<[1], [0], [0], [1], [0, 0, 1, 1], [], []>} : vector<8x4xf32>, vector<4x384xf32>, vector<8x384xf32> -> vector<8x384xf32>
    %30 = arith.addf %24, %29 : vector<8x384xf32>
    %c0_28 = arith.constant 0 : index
    %c0_29 = arith.constant 0 : index
    %c20 = arith.constant 20 : index
    %31 = vector.load %arg1[%c0_28, %c0_29, %c20] : memref<1x4x512xf32, #tpu.memory_space<vmem>>, vector<1x4x384xf32>
    %32 = vector.shape_cast %31 : vector<1x4x384xf32> to vector<4x384xf32>
    %c5 = arith.constant 5 : index
    %c0_30 = arith.constant 0 : index
    %c0_31 = arith.constant 0 : index
    %33 = vector.load %arg2[%c5, %c0_30, %c0_31] : memref<9x8x4xf32, #tpu.memory_space<vmem>>, vector<1x8x4xf32>
    %34 = vector.shape_cast %33 : vector<1x8x4xf32> to vector<8x4xf32>
    %cst_32 = arith.constant dense<0.000000e+00> : vector<8x384xf32>
    %35 = tpu.matmul %34, %32, %cst_32 {dimension_numbers = #tpu.dot_dimension_numbers<[1], [0], [0], [1], [0, 0, 1, 1], [], []>} : vector<8x4xf32>, vector<4x384xf32>, vector<8x384xf32> -> vector<8x384xf32>
    %36 = arith.addf %30, %35 : vector<8x384xf32>
    %c0_33 = arith.constant 0 : index
    %c0_34 = arith.constant 0 : index
    %c36 = arith.constant 36 : index
    %37 = vector.load %arg1[%c0_33, %c0_34, %c36] : memref<1x4x512xf32, #tpu.memory_space<vmem>>, vector<1x4x384xf32>
    %38 = vector.shape_cast %37 : vector<1x4x384xf32> to vector<4x384xf32>
    %c6 = arith.constant 6 : index
    %c0_35 = arith.constant 0 : index
    %c0_36 = arith.constant 0 : index
    %39 = vector.load %arg2[%c6, %c0_35, %c0_36] : memref<9x8x4xf32, #tpu.memory_space<vmem>>, vector<1x8x4xf32>
    %40 = vector.shape_cast %39 : vector<1x8x4xf32> to vector<8x4xf32>
    %cst_37 = arith.constant dense<0.000000e+00> : vector<8x384xf32>
    %41 = tpu.matmul %40, %38, %cst_37 {dimension_numbers = #tpu.dot_dimension_numbers<[1], [0], [0], [1], [0, 0, 1, 1], [], []>} : vector<8x4xf32>, vector<4x384xf32>, vector<8x384xf32> -> vector<8x384xf32>
    %42 = arith.addf %36, %41 : vector<8x384xf32>
    %c0_38 = arith.constant 0 : index
    %c0_39 = arith.constant 0 : index
    %c37 = arith.constant 37 : index
    %43 = vector.load %arg1[%c0_38, %c0_39, %c37] : memref<1x4x512xf32, #tpu.memory_space<vmem>>, vector<1x4x384xf32>
    %44 = vector.shape_cast %43 : vector<1x4x384xf32> to vector<4x384xf32>
    %c7 = arith.constant 7 : index
    %c0_40 = arith.constant 0 : index
    %c0_41 = arith.constant 0 : index
    %45 = vector.load %arg2[%c7, %c0_40, %c0_41] : memref<9x8x4xf32, #tpu.memory_space<vmem>>, vector<1x8x4xf32>
    %46 = vector.shape_cast %45 : vector<1x8x4xf32> to vector<8x4xf32>
    %cst_42 = arith.constant dense<0.000000e+00> : vector<8x384xf32>
    %47 = tpu.matmul %46, %44, %cst_42 {dimension_numbers = #tpu.dot_dimension_numbers<[1], [0], [0], [1], [0, 0, 1, 1], [], []>} : vector<8x4xf32>, vector<4x384xf32>, vector<8x384xf32> -> vector<8x384xf32>
    %48 = arith.addf %42, %47 : vector<8x384xf32>
    %c0_43 = arith.constant 0 : index
    %c0_44 = arith.constant 0 : index
    %c38 = arith.constant 38 : index
    %49 = vector.load %arg1[%c0_43, %c0_44, %c38] : memref<1x4x512xf32, #tpu.memory_space<vmem>>, vector<1x4x384xf32>
    %50 = vector.shape_cast %49 : vector<1x4x384xf32> to vector<4x384xf32>
    %c8 = arith.constant 8 : index
    %c0_45 = arith.constant 0 : index
    %c0_46 = arith.constant 0 : index
    %51 = vector.load %arg2[%c8, %c0_45, %c0_46] : memref<9x8x4xf32, #tpu.memory_space<vmem>>, vector<1x8x4xf32>
    %52 = vector.shape_cast %51 : vector<1x8x4xf32> to vector<8x4xf32>
    %cst_47 = arith.constant dense<0.000000e+00> : vector<8x384xf32>
    %53 = tpu.matmul %52, %50, %cst_47 {dimension_numbers = #tpu.dot_dimension_numbers<[1], [0], [0], [1], [0, 0, 1, 1], [], []>} : vector<8x4xf32>, vector<4x384xf32>, vector<8x384xf32> -> vector<8x384xf32>
    %54 = arith.addf %48, %53 : vector<8x384xf32>
    %c0_48 = arith.constant 0 : index
    %c0_49 = arith.constant 0 : index
    %55 = vector.load %arg3[%c0_48, %c0_49] : memref<8x1xf32, #tpu.memory_space<vmem>>, vector<8x1xf32>
    %56 = vector.broadcast %55 : vector<8x1xf32> to vector<8x384xf32>
    %57 = arith.addf %54, %56 : vector<8x384xf32>
    %cst_50 = arith.constant 0.000000e+00 : f32
    %58 = vector.broadcast %cst_50 : f32 to vector<8x384xf32>
    %59 = arith.maximumf %57, %58 : vector<8x384xf32>
    %c0_51 = arith.constant 0 : index
    %c0_52 = arith.constant 0 : index
    %c0_53 = arith.constant 0 : index
    %60 = vector.load %arg4[%c0_51, %c0_52, %c0_53] : memref<1x8x384xf32, #tpu.memory_space<vmem>>, vector<1x8x384xf32>
    %61 = vector.shape_cast %60 : vector<1x8x384xf32> to vector<8x384xf32>
    %62 = vector.shape_cast %59 : vector<8x384xf32> to vector<1x8x384xf32>
    tpu.vector_store %arg4[%c0_51, %c0_52, %c0_53], %62 {strides = array<i32>} : memref<1x8x384xf32, #tpu.memory_space<vmem>>, vector<1x8x384xf32>,
    return
  }
  func.func @transform_0(%arg0: i32) -> (i32, i32, i32) {
    %c0_i32 = arith.constant 0 : i32
    %c0_i32_0 = arith.constant 0 : i32
    %c0_i32_1 = arith.constant 0 : i32
    return %arg0, %c0_i32, %c0_i32_0 : i32, i32, i32
  }
  func.func @transform_1(%arg0: i32) -> (i32, i32, i32) {
    %c0_i32 = arith.constant 0 : i32
    %c0_i32_0 = arith.constant 0 : i32
    %c0_i32_1 = arith.constant 0 : i32
    %c0_i32_2 = arith.constant 0 : i32
    return %c0_i32, %c0_i32_0, %c0_i32_1 : i32, i32, i32
  }
  func.func @transform_2(%arg0: i32) -> (i32, i32) {
    %c0_i32 = arith.constant 0 : i32
    %c0_i32_0 = arith.constant 0 : i32
    %c0_i32_1 = arith.constant 0 : i32
    return %c0_i32, %c0_i32_0 : i32, i32
  }
  func.func @transform_3(%arg0: i32) -> (i32, i32, i32) {
    %c0_i32 = arith.constant 0 : i32
    %c0_i32_0 = arith.constant 0 : i32
    %c0_i32_1 = arith.constant 0 : i32
    return %arg0, %c0_i32, %c0_i32_0 : i32, i32, i32
  }
}

module attributes {stable_mosaic.version = 11 : i64} {
  func.func @_conv3x3_kernel(%arg0: i32, %arg1: memref<1x8x512xf32, #tpu.memory_space<vmem>>, %arg2: memref<9x8x8xf32, #tpu.memory_space<vmem>>, %arg3: memref<8x1xf32, #tpu.memory_space<vmem>>, %arg4: memref<1x8x384xf32, #tpu.memory_space<vmem>>) attributes {dimension_semantics = [#tpu.dimension_semantics<parallel>], iteration_bounds = array<i64: 2>, scalar_prefetch = 0 : i64, scratch_operands = 0 : i64, tpu.core_type = #tpu.core_type<tc>, window_params = [{transform_indices = @transform_0, window_bounds = array<i64: 1, 8, 512>}, {pipeline_mode = #tpu.pipeline_mode<synchronous>, transform_indices = @transform_1, window_bounds = array<i64: 9, 8, 8>}, {pipeline_mode = #tpu.pipeline_mode<synchronous>, transform_indices = @transform_2, window_bounds = array<i64: 8, 1>}, {transform_indices = @transform_3, window_bounds = array<i64: 1, 8, 384>}]} {
    %cst = arith.constant 0.000000e+00 : f32
    %0 = vector.broadcast %cst : f32 to vector<8x384xf32>
    %c0 = arith.constant 0 : index
    %c0_0 = arith.constant 0 : index
    %c0_1 = arith.constant 0 : index
    %1 = vector.load %arg1[%c0, %c0_0, %c0_1] : memref<1x8x512xf32, #tpu.memory_space<vmem>>, vector<1x8x384xf32>
    %2 = vector.shape_cast %1 : vector<1x8x384xf32> to vector<8x384xf32>
    %c0_2 = arith.constant 0 : index
    %c0_3 = arith.constant 0 : index
    %c0_4 = arith.constant 0 : index
    %3 = vector.load %arg2[%c0_2, %c0_3, %c0_4] : memref<9x8x8xf32, #tpu.memory_space<vmem>>, vector<1x8x8xf32>
    %4 = vector.shape_cast %3 : vector<1x8x8xf32> to vector<8x8xf32>
    %cst_5 = arith.constant dense<0.000000e+00> : vector<8x384xf32>
    %5 = tpu.matmul %4, %2, %cst_5 {dimension_numbers = #tpu.dot_dimension_numbers<[1], [0], [0], [1], [0, 0, 1, 1], [], []>} : vector<8x8xf32>, vector<8x384xf32>, vector<8x384xf32> -> vector<8x384xf32>
    %6 = arith.addf %0, %5 : vector<8x384xf32>
    %c0_6 = arith.constant 0 : index
    %c0_7 = arith.constant 0 : index
    %c1 = arith.constant 1 : index
    %7 = vector.load %arg1[%c0_6, %c0_7, %c1] : memref<1x8x512xf32, #tpu.memory_space<vmem>>, vector<1x8x384xf32>
    %8 = vector.shape_cast %7 : vector<1x8x384xf32> to vector<8x384xf32>
    %c1_8 = arith.constant 1 : index
    %c0_9 = arith.constant 0 : index
    %c0_10 = arith.constant 0 : index
    %9 = vector.load %arg2[%c1_8, %c0_9, %c0_10] : memref<9x8x8xf32, #tpu.memory_space<vmem>>, vector<1x8x8xf32>
    %10 = vector.shape_cast %9 : vector<1x8x8xf32> to vector<8x8xf32>
    %cst_11 = arith.constant dense<0.000000e+00> : vector<8x384xf32>
    %11 = tpu.matmul %10, %8, %cst_11 {dimension_numbers = #tpu.dot_dimension_numbers<[1], [0], [0], [1], [0, 0, 1, 1], [], []>} : vector<8x8xf32>, vector<8x384xf32>, vector<8x384xf32> -> vector<8x384xf32>
    %12 = arith.addf %6, %11 : vector<8x384xf32>
    %c0_12 = arith.constant 0 : index
    %c0_13 = arith.constant 0 : index
    %c2 = arith.constant 2 : index
    %13 = vector.load %arg1[%c0_12, %c0_13, %c2] : memref<1x8x512xf32, #tpu.memory_space<vmem>>, vector<1x8x384xf32>
    %14 = vector.shape_cast %13 : vector<1x8x384xf32> to vector<8x384xf32>
    %c2_14 = arith.constant 2 : index
    %c0_15 = arith.constant 0 : index
    %c0_16 = arith.constant 0 : index
    %15 = vector.load %arg2[%c2_14, %c0_15, %c0_16] : memref<9x8x8xf32, #tpu.memory_space<vmem>>, vector<1x8x8xf32>
    %16 = vector.shape_cast %15 : vector<1x8x8xf32> to vector<8x8xf32>
    %cst_17 = arith.constant dense<0.000000e+00> : vector<8x384xf32>
    %17 = tpu.matmul %16, %14, %cst_17 {dimension_numbers = #tpu.dot_dimension_numbers<[1], [0], [0], [1], [0, 0, 1, 1], [], []>} : vector<8x8xf32>, vector<8x384xf32>, vector<8x384xf32> -> vector<8x384xf32>
    %18 = arith.addf %12, %17 : vector<8x384xf32>
    %c0_18 = arith.constant 0 : index
    %c0_19 = arith.constant 0 : index
    %c18 = arith.constant 18 : index
    %19 = vector.load %arg1[%c0_18, %c0_19, %c18] : memref<1x8x512xf32, #tpu.memory_space<vmem>>, vector<1x8x384xf32>
    %20 = vector.shape_cast %19 : vector<1x8x384xf32> to vector<8x384xf32>
    %c3 = arith.constant 3 : index
    %c0_20 = arith.constant 0 : index
    %c0_21 = arith.constant 0 : index
    %21 = vector.load %arg2[%c3, %c0_20, %c0_21] : memref<9x8x8xf32, #tpu.memory_space<vmem>>, vector<1x8x8xf32>
    %22 = vector.shape_cast %21 : vector<1x8x8xf32> to vector<8x8xf32>
    %cst_22 = arith.constant dense<0.000000e+00> : vector<8x384xf32>
    %23 = tpu.matmul %22, %20, %cst_22 {dimension_numbers = #tpu.dot_dimension_numbers<[1], [0], [0], [1], [0, 0, 1, 1], [], []>} : vector<8x8xf32>, vector<8x384xf32>, vector<8x384xf32> -> vector<8x384xf32>
    %24 = arith.addf %18, %23 : vector<8x384xf32>
    %c0_23 = arith.constant 0 : index
    %c0_24 = arith.constant 0 : index
    %c19 = arith.constant 19 : index
    %25 = vector.load %arg1[%c0_23, %c0_24, %c19] : memref<1x8x512xf32, #tpu.memory_space<vmem>>, vector<1x8x384xf32>
    %26 = vector.shape_cast %25 : vector<1x8x384xf32> to vector<8x384xf32>
    %c4 = arith.constant 4 : index
    %c0_25 = arith.constant 0 : index
    %c0_26 = arith.constant 0 : index
    %27 = vector.load %arg2[%c4, %c0_25, %c0_26] : memref<9x8x8xf32, #tpu.memory_space<vmem>>, vector<1x8x8xf32>
    %28 = vector.shape_cast %27 : vector<1x8x8xf32> to vector<8x8xf32>
    %cst_27 = arith.constant dense<0.000000e+00> : vector<8x384xf32>
    %29 = tpu.matmul %28, %26, %cst_27 {dimension_numbers = #tpu.dot_dimension_numbers<[1], [0], [0], [1], [0, 0, 1, 1], [], []>} : vector<8x8xf32>, vector<8x384xf32>, vector<8x384xf32> -> vector<8x384xf32>
    %30 = arith.addf %24, %29 : vector<8x384xf32>
    %c0_28 = arith.constant 0 : index
    %c0_29 = arith.constant 0 : index
    %c20 = arith.constant 20 : index
    %31 = vector.load %arg1[%c0_28, %c0_29, %c20] : memref<1x8x512xf32, #tpu.memory_space<vmem>>, vector<1x8x384xf32>
    %32 = vector.shape_cast %31 : vector<1x8x384xf32> to vector<8x384xf32>
    %c5 = arith.constant 5 : index
    %c0_30 = arith.constant 0 : index
    %c0_31 = arith.constant 0 : index
    %33 = vector.load %arg2[%c5, %c0_30, %c0_31] : memref<9x8x8xf32, #tpu.memory_space<vmem>>, vector<1x8x8xf32>
    %34 = vector.shape_cast %33 : vector<1x8x8xf32> to vector<8x8xf32>
    %cst_32 = arith.constant dense<0.000000e+00> : vector<8x384xf32>
    %35 = tpu.matmul %34, %32, %cst_32 {dimension_numbers = #tpu.dot_dimension_numbers<[1], [0], [0], [1], [0, 0, 1, 1], [], []>} : vector<8x8xf32>, vector<8x384xf32>, vector<8x384xf32> -> vector<8x384xf32>
    %36 = arith.addf %30, %35 : vector<8x384xf32>
    %c0_33 = arith.constant 0 : index
    %c0_34 = arith.constant 0 : index
    %c36 = arith.constant 36 : index
    %37 = vector.load %arg1[%c0_33, %c0_34, %c36] : memref<1x8x512xf32, #tpu.memory_space<vmem>>, vector<1x8x384xf32>
    %38 = vector.shape_cast %37 : vector<1x8x384xf32> to vector<8x384xf32>
    %c6 = arith.constant 6 : index
    %c0_35 = arith.constant 0 : index
    %c0_36 = arith.constant 0 : index
    %39 = vector.load %arg2[%c6, %c0_35, %c0_36] : memref<9x8x8xf32, #tpu.memory_space<vmem>>, vector<1x8x8xf32>
    %40 = vector.shape_cast %39 : vector<1x8x8xf32> to vector<8x8xf32>
    %cst_37 = arith.constant dense<0.000000e+00> : vector<8x384xf32>
    %41 = tpu.matmul %40, %38, %cst_37 {dimension_numbers = #tpu.dot_dimension_numbers<[1], [0], [0], [1], [0, 0, 1, 1], [], []>} : vector<8x8xf32>, vector<8x384xf32>, vector<8x384xf32> -> vector<8x384xf32>
    %42 = arith.addf %36, %41 : vector<8x384xf32>
    %c0_38 = arith.constant 0 : index
    %c0_39 = arith.constant 0 : index
    %c37 = arith.constant 37 : index
    %43 = vector.load %arg1[%c0_38, %c0_39, %c37] : memref<1x8x512xf32, #tpu.memory_space<vmem>>, vector<1x8x384xf32>
    %44 = vector.shape_cast %43 : vector<1x8x384xf32> to vector<8x384xf32>
    %c7 = arith.constant 7 : index
    %c0_40 = arith.constant 0 : index
    %c0_41 = arith.constant 0 : index
    %45 = vector.load %arg2[%c7, %c0_40, %c0_41] : memref<9x8x8xf32, #tpu.memory_space<vmem>>, vector<1x8x8xf32>
    %46 = vector.shape_cast %45 : vector<1x8x8xf32> to vector<8x8xf32>
    %cst_42 = arith.constant dense<0.000000e+00> : vector<8x384xf32>
    %47 = tpu.matmul %46, %44, %cst_42 {dimension_numbers = #tpu.dot_dimension_numbers<[1], [0], [0], [1], [0, 0, 1, 1], [], []>} : vector<8x8xf32>, vector<8x384xf32>, vector<8x384xf32> -> vector<8x384xf32>
    %48 = arith.addf %42, %47 : vector<8x384xf32>
    %c0_43 = arith.constant 0 : index
    %c0_44 = arith.constant 0 : index
    %c38 = arith.constant 38 : index
    %49 = vector.load %arg1[%c0_43, %c0_44, %c38] : memref<1x8x512xf32, #tpu.memory_space<vmem>>, vector<1x8x384xf32>
    %50 = vector.shape_cast %49 : vector<1x8x384xf32> to vector<8x384xf32>
    %c8 = arith.constant 8 : index
    %c0_45 = arith.constant 0 : index
    %c0_46 = arith.constant 0 : index
    %51 = vector.load %arg2[%c8, %c0_45, %c0_46] : memref<9x8x8xf32, #tpu.memory_space<vmem>>, vector<1x8x8xf32>
    %52 = vector.shape_cast %51 : vector<1x8x8xf32> to vector<8x8xf32>
    %cst_47 = arith.constant dense<0.000000e+00> : vector<8x384xf32>
    %53 = tpu.matmul %52, %50, %cst_47 {dimension_numbers = #tpu.dot_dimension_numbers<[1], [0], [0], [1], [0, 0, 1, 1], [], []>} : vector<8x8xf32>, vector<8x384xf32>, vector<8x384xf32> -> vector<8x384xf32>
    %54 = arith.addf %48, %53 : vector<8x384xf32>
    %c0_48 = arith.constant 0 : index
    %c0_49 = arith.constant 0 : index
    %55 = vector.load %arg3[%c0_48, %c0_49] : memref<8x1xf32, #tpu.memory_space<vmem>>, vector<8x1xf32>
    %56 = vector.broadcast %55 : vector<8x1xf32> to vector<8x384xf32>
    %57 = arith.addf %54, %56 : vector<8x384xf32>
    %cst_50 = arith.constant 0.000000e+00 : f32
    %58 = vector.broadcast %cst_50 : f32 to vector<8x384xf32>
    %59 = arith.maximumf %57, %58 : vector<8x384xf32>
    %c0_51 = arith.constant 0 : index
    %c0_52 = arith.constant 0 : index
    %c19_53 = arith.constant 19 : index
    %60 = vector.load %arg1[%c0_51, %c0_52, %c19_53] : memref<1x8x512xf32, #tpu.memory_space<vmem>>, vector<1x8x384xf32>
    %61 = vector.shape_cast %60 : vector<1x8x384xf32> to vector<8x384xf32>
    %62 = arith.addf %59, %61 : vector<8x384xf32>
    %c0_54 = arith.constant 0 : index
    %c0_55 = arith.constant 0 : index
    %c0_56 = arith.constant 0 : index
    %63 = vector.load %arg4[%c0_54, %c0_55, %c0_56] : memref<1x8x384xf32, #tpu.memory_space<vmem>>, vector<1x8x384xf32>
    %64 = vector.shape_cast %63 : vector<1x8x384xf32> to vector<8x384xf32>
    %65 = vector.shape_cast %62 : vector<8x384xf32> to vector<1x8x384xf32>
    tpu.vector_store %arg4[%c0_54, %c0_55, %c0_56], %65 {strides = array<i32>} : memref<1x8x384xf32, #tpu.memory_space<vmem>>, vector<1x8x384xf32>,
    return
  }
  func.func @transform_0(%arg0: i32) -> (i32, i32, i32) {
    %c0_i32 = arith.constant 0 : i32
    %c0_i32_0 = arith.constant 0 : i32
    %c0_i32_1 = arith.constant 0 : i32
    return %arg0, %c0_i32, %c0_i32_0 : i32, i32, i32
  }
  func.func @transform_1(%arg0: i32) -> (i32, i32, i32) {
    %c0_i32 = arith.constant 0 : i32
    %c0_i32_0 = arith.constant 0 : i32
    %c0_i32_1 = arith.constant 0 : i32
    %c0_i32_2 = arith.constant 0 : i32
    return %c0_i32, %c0_i32_0, %c0_i32_1 : i32, i32, i32
  }
  func.func @transform_2(%arg0: i32) -> (i32, i32) {
    %c0_i32 = arith.constant 0 : i32
    %c0_i32_0 = arith.constant 0 : i32
    %c0_i32_1 = arith.constant 0 : i32
    return %c0_i32, %c0_i32_0 : i32, i32
  }
  func.func @transform_3(%arg0: i32) -> (i32, i32, i32) {
    %c0_i32 = arith.constant 0 : i32
    %c0_i32_0 = arith.constant 0 : i32
    %c0_i32_1 = arith.constant 0 : i32
    return %arg0, %c0_i32, %c0_i32_0 : i32, i32, i32
  }
}

module attributes {stable_mosaic.version = 11 : i64} {
  func.func @_conv3x3_kernel(%arg0: i32, %arg1: memref<1x8x256xf32, #tpu.memory_space<vmem>>, %arg2: memref<9x16x8xf32, #tpu.memory_space<vmem>>, %arg3: memref<16x1xf32, #tpu.memory_space<vmem>>, %arg4: memref<1x16x128xf32, #tpu.memory_space<vmem>>) attributes {dimension_semantics = [#tpu.dimension_semantics<parallel>], iteration_bounds = array<i64: 2>, scalar_prefetch = 0 : i64, scratch_operands = 0 : i64, tpu.core_type = #tpu.core_type<tc>, window_params = [{transform_indices = @transform_0, window_bounds = array<i64: 1, 8, 256>}, {pipeline_mode = #tpu.pipeline_mode<synchronous>, transform_indices = @transform_1, window_bounds = array<i64: 9, 16, 8>}, {pipeline_mode = #tpu.pipeline_mode<synchronous>, transform_indices = @transform_2, window_bounds = array<i64: 16, 1>}, {transform_indices = @transform_3, window_bounds = array<i64: 1, 16, 128>}]} {
    %cst = arith.constant 0.000000e+00 : f32
    %0 = vector.broadcast %cst : f32 to vector<16x128xf32>
    %c0 = arith.constant 0 : index
    %c0_0 = arith.constant 0 : index
    %c0_1 = arith.constant 0 : index
    %1 = vector.load %arg1[%c0, %c0_0, %c0_1] : memref<1x8x256xf32, #tpu.memory_space<vmem>>, vector<1x8x128xf32>
    %2 = vector.shape_cast %1 : vector<1x8x128xf32> to vector<8x128xf32>
    %c0_2 = arith.constant 0 : index
    %c0_3 = arith.constant 0 : index
    %c0_4 = arith.constant 0 : index
    %3 = vector.load %arg2[%c0_2, %c0_3, %c0_4] : memref<9x16x8xf32, #tpu.memory_space<vmem>>, vector<1x16x8xf32>
    %4 = vector.shape_cast %3 : vector<1x16x8xf32> to vector<16x8xf32>
    %cst_5 = arith.constant dense<0.000000e+00> : vector<16x128xf32>
    %5 = tpu.matmul %4, %2, %cst_5 {dimension_numbers = #tpu.dot_dimension_numbers<[1], [0], [0], [1], [0, 0, 1, 1], [], []>} : vector<16x8xf32>, vector<8x128xf32>, vector<16x128xf32> -> vector<16x128xf32>
    %6 = arith.addf %0, %5 : vector<16x128xf32>
    %c0_6 = arith.constant 0 : index
    %c0_7 = arith.constant 0 : index
    %c1 = arith.constant 1 : index
    %7 = vector.load %arg1[%c0_6, %c0_7, %c1] : memref<1x8x256xf32, #tpu.memory_space<vmem>>, vector<1x8x128xf32>
    %8 = vector.shape_cast %7 : vector<1x8x128xf32> to vector<8x128xf32>
    %c1_8 = arith.constant 1 : index
    %c0_9 = arith.constant 0 : index
    %c0_10 = arith.constant 0 : index
    %9 = vector.load %arg2[%c1_8, %c0_9, %c0_10] : memref<9x16x8xf32, #tpu.memory_space<vmem>>, vector<1x16x8xf32>
    %10 = vector.shape_cast %9 : vector<1x16x8xf32> to vector<16x8xf32>
    %cst_11 = arith.constant dense<0.000000e+00> : vector<16x128xf32>
    %11 = tpu.matmul %10, %8, %cst_11 {dimension_numbers = #tpu.dot_dimension_numbers<[1], [0], [0], [1], [0, 0, 1, 1], [], []>} : vector<16x8xf32>, vector<8x128xf32>, vector<16x128xf32> -> vector<16x128xf32>
    %12 = arith.addf %6, %11 : vector<16x128xf32>
    %c0_12 = arith.constant 0 : index
    %c0_13 = arith.constant 0 : index
    %c2 = arith.constant 2 : index
    %13 = vector.load %arg1[%c0_12, %c0_13, %c2] : memref<1x8x256xf32, #tpu.memory_space<vmem>>, vector<1x8x128xf32>
    %14 = vector.shape_cast %13 : vector<1x8x128xf32> to vector<8x128xf32>
    %c2_14 = arith.constant 2 : index
    %c0_15 = arith.constant 0 : index
    %c0_16 = arith.constant 0 : index
    %15 = vector.load %arg2[%c2_14, %c0_15, %c0_16] : memref<9x16x8xf32, #tpu.memory_space<vmem>>, vector<1x16x8xf32>
    %16 = vector.shape_cast %15 : vector<1x16x8xf32> to vector<16x8xf32>
    %cst_17 = arith.constant dense<0.000000e+00> : vector<16x128xf32>
    %17 = tpu.matmul %16, %14, %cst_17 {dimension_numbers = #tpu.dot_dimension_numbers<[1], [0], [0], [1], [0, 0, 1, 1], [], []>} : vector<16x8xf32>, vector<8x128xf32>, vector<16x128xf32> -> vector<16x128xf32>
    %18 = arith.addf %12, %17 : vector<16x128xf32>
    %c0_18 = arith.constant 0 : index
    %c0_19 = arith.constant 0 : index
    %c10 = arith.constant 10 : index
    %19 = vector.load %arg1[%c0_18, %c0_19, %c10] : memref<1x8x256xf32, #tpu.memory_space<vmem>>, vector<1x8x128xf32>
    %20 = vector.shape_cast %19 : vector<1x8x128xf32> to vector<8x128xf32>
    %c3 = arith.constant 3 : index
    %c0_20 = arith.constant 0 : index
    %c0_21 = arith.constant 0 : index
    %21 = vector.load %arg2[%c3, %c0_20, %c0_21] : memref<9x16x8xf32, #tpu.memory_space<vmem>>, vector<1x16x8xf32>
    %22 = vector.shape_cast %21 : vector<1x16x8xf32> to vector<16x8xf32>
    %cst_22 = arith.constant dense<0.000000e+00> : vector<16x128xf32>
    %23 = tpu.matmul %22, %20, %cst_22 {dimension_numbers = #tpu.dot_dimension_numbers<[1], [0], [0], [1], [0, 0, 1, 1], [], []>} : vector<16x8xf32>, vector<8x128xf32>, vector<16x128xf32> -> vector<16x128xf32>
    %24 = arith.addf %18, %23 : vector<16x128xf32>
    %c0_23 = arith.constant 0 : index
    %c0_24 = arith.constant 0 : index
    %c11 = arith.constant 11 : index
    %25 = vector.load %arg1[%c0_23, %c0_24, %c11] : memref<1x8x256xf32, #tpu.memory_space<vmem>>, vector<1x8x128xf32>
    %26 = vector.shape_cast %25 : vector<1x8x128xf32> to vector<8x128xf32>
    %c4 = arith.constant 4 : index
    %c0_25 = arith.constant 0 : index
    %c0_26 = arith.constant 0 : index
    %27 = vector.load %arg2[%c4, %c0_25, %c0_26] : memref<9x16x8xf32, #tpu.memory_space<vmem>>, vector<1x16x8xf32>
    %28 = vector.shape_cast %27 : vector<1x16x8xf32> to vector<16x8xf32>
    %cst_27 = arith.constant dense<0.000000e+00> : vector<16x128xf32>
    %29 = tpu.matmul %28, %26, %cst_27 {dimension_numbers = #tpu.dot_dimension_numbers<[1], [0], [0], [1], [0, 0, 1, 1], [], []>} : vector<16x8xf32>, vector<8x128xf32>, vector<16x128xf32> -> vector<16x128xf32>
    %30 = arith.addf %24, %29 : vector<16x128xf32>
    %c0_28 = arith.constant 0 : index
    %c0_29 = arith.constant 0 : index
    %c12 = arith.constant 12 : index
    %31 = vector.load %arg1[%c0_28, %c0_29, %c12] : memref<1x8x256xf32, #tpu.memory_space<vmem>>, vector<1x8x128xf32>
    %32 = vector.shape_cast %31 : vector<1x8x128xf32> to vector<8x128xf32>
    %c5 = arith.constant 5 : index
    %c0_30 = arith.constant 0 : index
    %c0_31 = arith.constant 0 : index
    %33 = vector.load %arg2[%c5, %c0_30, %c0_31] : memref<9x16x8xf32, #tpu.memory_space<vmem>>, vector<1x16x8xf32>
    %34 = vector.shape_cast %33 : vector<1x16x8xf32> to vector<16x8xf32>
    %cst_32 = arith.constant dense<0.000000e+00> : vector<16x128xf32>
    %35 = tpu.matmul %34, %32, %cst_32 {dimension_numbers = #tpu.dot_dimension_numbers<[1], [0], [0], [1], [0, 0, 1, 1], [], []>} : vector<16x8xf32>, vector<8x128xf32>, vector<16x128xf32> -> vector<16x128xf32>
    %36 = arith.addf %30, %35 : vector<16x128xf32>
    %c0_33 = arith.constant 0 : index
    %c0_34 = arith.constant 0 : index
    %c20 = arith.constant 20 : index
    %37 = vector.load %arg1[%c0_33, %c0_34, %c20] : memref<1x8x256xf32, #tpu.memory_space<vmem>>, vector<1x8x128xf32>
    %38 = vector.shape_cast %37 : vector<1x8x128xf32> to vector<8x128xf32>
    %c6 = arith.constant 6 : index
    %c0_35 = arith.constant 0 : index
    %c0_36 = arith.constant 0 : index
    %39 = vector.load %arg2[%c6, %c0_35, %c0_36] : memref<9x16x8xf32, #tpu.memory_space<vmem>>, vector<1x16x8xf32>
    %40 = vector.shape_cast %39 : vector<1x16x8xf32> to vector<16x8xf32>
    %cst_37 = arith.constant dense<0.000000e+00> : vector<16x128xf32>
    %41 = tpu.matmul %40, %38, %cst_37 {dimension_numbers = #tpu.dot_dimension_numbers<[1], [0], [0], [1], [0, 0, 1, 1], [], []>} : vector<16x8xf32>, vector<8x128xf32>, vector<16x128xf32> -> vector<16x128xf32>
    %42 = arith.addf %36, %41 : vector<16x128xf32>
    %c0_38 = arith.constant 0 : index
    %c0_39 = arith.constant 0 : index
    %c21 = arith.constant 21 : index
    %43 = vector.load %arg1[%c0_38, %c0_39, %c21] : memref<1x8x256xf32, #tpu.memory_space<vmem>>, vector<1x8x128xf32>
    %44 = vector.shape_cast %43 : vector<1x8x128xf32> to vector<8x128xf32>
    %c7 = arith.constant 7 : index
    %c0_40 = arith.constant 0 : index
    %c0_41 = arith.constant 0 : index
    %45 = vector.load %arg2[%c7, %c0_40, %c0_41] : memref<9x16x8xf32, #tpu.memory_space<vmem>>, vector<1x16x8xf32>
    %46 = vector.shape_cast %45 : vector<1x16x8xf32> to vector<16x8xf32>
    %cst_42 = arith.constant dense<0.000000e+00> : vector<16x128xf32>
    %47 = tpu.matmul %46, %44, %cst_42 {dimension_numbers = #tpu.dot_dimension_numbers<[1], [0], [0], [1], [0, 0, 1, 1], [], []>} : vector<16x8xf32>, vector<8x128xf32>, vector<16x128xf32> -> vector<16x128xf32>
    %48 = arith.addf %42, %47 : vector<16x128xf32>
    %c0_43 = arith.constant 0 : index
    %c0_44 = arith.constant 0 : index
    %c22 = arith.constant 22 : index
    %49 = vector.load %arg1[%c0_43, %c0_44, %c22] : memref<1x8x256xf32, #tpu.memory_space<vmem>>, vector<1x8x128xf32>
    %50 = vector.shape_cast %49 : vector<1x8x128xf32> to vector<8x128xf32>
    %c8 = arith.constant 8 : index
    %c0_45 = arith.constant 0 : index
    %c0_46 = arith.constant 0 : index
    %51 = vector.load %arg2[%c8, %c0_45, %c0_46] : memref<9x16x8xf32, #tpu.memory_space<vmem>>, vector<1x16x8xf32>
    %52 = vector.shape_cast %51 : vector<1x16x8xf32> to vector<16x8xf32>
    %cst_47 = arith.constant dense<0.000000e+00> : vector<16x128xf32>
    %53 = tpu.matmul %52, %50, %cst_47 {dimension_numbers = #tpu.dot_dimension_numbers<[1], [0], [0], [1], [0, 0, 1, 1], [], []>} : vector<16x8xf32>, vector<8x128xf32>, vector<16x128xf32> -> vector<16x128xf32>
    %54 = arith.addf %48, %53 : vector<16x128xf32>
    %c0_48 = arith.constant 0 : index
    %c0_49 = arith.constant 0 : index
    %55 = vector.load %arg3[%c0_48, %c0_49] : memref<16x1xf32, #tpu.memory_space<vmem>>, vector<16x1xf32>
    %56 = vector.broadcast %55 : vector<16x1xf32> to vector<16x128xf32>
    %57 = arith.addf %54, %56 : vector<16x128xf32>
    %cst_50 = arith.constant 0.000000e+00 : f32
    %58 = vector.broadcast %cst_50 : f32 to vector<16x128xf32>
    %59 = arith.maximumf %57, %58 : vector<16x128xf32>
    %c0_51 = arith.constant 0 : index
    %c0_52 = arith.constant 0 : index
    %c0_53 = arith.constant 0 : index
    %60 = vector.load %arg4[%c0_51, %c0_52, %c0_53] : memref<1x16x128xf32, #tpu.memory_space<vmem>>, vector<1x16x128xf32>
    %61 = vector.shape_cast %60 : vector<1x16x128xf32> to vector<16x128xf32>
    %62 = vector.shape_cast %59 : vector<16x128xf32> to vector<1x16x128xf32>
    tpu.vector_store %arg4[%c0_51, %c0_52, %c0_53], %62 {strides = array<i32>} : memref<1x16x128xf32, #tpu.memory_space<vmem>>, vector<1x16x128xf32>,
    return
  }
  func.func @transform_0(%arg0: i32) -> (i32, i32, i32) {
    %c0_i32 = arith.constant 0 : i32
    %c0_i32_0 = arith.constant 0 : i32
    %c0_i32_1 = arith.constant 0 : i32
    return %arg0, %c0_i32, %c0_i32_0 : i32, i32, i32
  }
  func.func @transform_1(%arg0: i32) -> (i32, i32, i32) {
    %c0_i32 = arith.constant 0 : i32
    %c0_i32_0 = arith.constant 0 : i32
    %c0_i32_1 = arith.constant 0 : i32
    %c0_i32_2 = arith.constant 0 : i32
    return %c0_i32, %c0_i32_0, %c0_i32_1 : i32, i32, i32
  }
  func.func @transform_2(%arg0: i32) -> (i32, i32) {
    %c0_i32 = arith.constant 0 : i32
    %c0_i32_0 = arith.constant 0 : i32
    %c0_i32_1 = arith.constant 0 : i32
    return %c0_i32, %c0_i32_0 : i32, i32
  }
  func.func @transform_3(%arg0: i32) -> (i32, i32, i32) {
    %c0_i32 = arith.constant 0 : i32
    %c0_i32_0 = arith.constant 0 : i32
    %c0_i32_1 = arith.constant 0 : i32
    return %arg0, %c0_i32, %c0_i32_0 : i32, i32, i32
  }
}

module attributes {stable_mosaic.version = 11 : i64} {
  func.func @_conv3x3_kernel(%arg0: i32, %arg1: memref<1x16x256xf32, #tpu.memory_space<vmem>>, %arg2: memref<9x16x16xf32, #tpu.memory_space<vmem>>, %arg3: memref<16x1xf32, #tpu.memory_space<vmem>>, %arg4: memref<1x16x128xf32, #tpu.memory_space<vmem>>) attributes {dimension_semantics = [#tpu.dimension_semantics<parallel>], iteration_bounds = array<i64: 2>, scalar_prefetch = 0 : i64, scratch_operands = 0 : i64, tpu.core_type = #tpu.core_type<tc>, window_params = [{transform_indices = @transform_0, window_bounds = array<i64: 1, 16, 256>}, {pipeline_mode = #tpu.pipeline_mode<synchronous>, transform_indices = @transform_1, window_bounds = array<i64: 9, 16, 16>}, {pipeline_mode = #tpu.pipeline_mode<synchronous>, transform_indices = @transform_2, window_bounds = array<i64: 16, 1>}, {transform_indices = @transform_3, window_bounds = array<i64: 1, 16, 128>}]} {
    %cst = arith.constant 0.000000e+00 : f32
    %0 = vector.broadcast %cst : f32 to vector<16x128xf32>
    %c0 = arith.constant 0 : index
    %c0_0 = arith.constant 0 : index
    %c0_1 = arith.constant 0 : index
    %1 = vector.load %arg1[%c0, %c0_0, %c0_1] : memref<1x16x256xf32, #tpu.memory_space<vmem>>, vector<1x16x128xf32>
    %2 = vector.shape_cast %1 : vector<1x16x128xf32> to vector<16x128xf32>
    %c0_2 = arith.constant 0 : index
    %c0_3 = arith.constant 0 : index
    %c0_4 = arith.constant 0 : index
    %3 = vector.load %arg2[%c0_2, %c0_3, %c0_4] : memref<9x16x16xf32, #tpu.memory_space<vmem>>, vector<1x16x16xf32>
    %4 = vector.shape_cast %3 : vector<1x16x16xf32> to vector<16x16xf32>
    %cst_5 = arith.constant dense<0.000000e+00> : vector<16x128xf32>
    %5 = tpu.matmul %4, %2, %cst_5 {dimension_numbers = #tpu.dot_dimension_numbers<[1], [0], [0], [1], [0, 0, 1, 1], [], []>} : vector<16x16xf32>, vector<16x128xf32>, vector<16x128xf32> -> vector<16x128xf32>
    %6 = arith.addf %0, %5 : vector<16x128xf32>
    %c0_6 = arith.constant 0 : index
    %c0_7 = arith.constant 0 : index
    %c1 = arith.constant 1 : index
    %7 = vector.load %arg1[%c0_6, %c0_7, %c1] : memref<1x16x256xf32, #tpu.memory_space<vmem>>, vector<1x16x128xf32>
    %8 = vector.shape_cast %7 : vector<1x16x128xf32> to vector<16x128xf32>
    %c1_8 = arith.constant 1 : index
    %c0_9 = arith.constant 0 : index
    %c0_10 = arith.constant 0 : index
    %9 = vector.load %arg2[%c1_8, %c0_9, %c0_10] : memref<9x16x16xf32, #tpu.memory_space<vmem>>, vector<1x16x16xf32>
    %10 = vector.shape_cast %9 : vector<1x16x16xf32> to vector<16x16xf32>
    %cst_11 = arith.constant dense<0.000000e+00> : vector<16x128xf32>
    %11 = tpu.matmul %10, %8, %cst_11 {dimension_numbers = #tpu.dot_dimension_numbers<[1], [0], [0], [1], [0, 0, 1, 1], [], []>} : vector<16x16xf32>, vector<16x128xf32>, vector<16x128xf32> -> vector<16x128xf32>
    %12 = arith.addf %6, %11 : vector<16x128xf32>
    %c0_12 = arith.constant 0 : index
    %c0_13 = arith.constant 0 : index
    %c2 = arith.constant 2 : index
    %13 = vector.load %arg1[%c0_12, %c0_13, %c2] : memref<1x16x256xf32, #tpu.memory_space<vmem>>, vector<1x16x128xf32>
    %14 = vector.shape_cast %13 : vector<1x16x128xf32> to vector<16x128xf32>
    %c2_14 = arith.constant 2 : index
    %c0_15 = arith.constant 0 : index
    %c0_16 = arith.constant 0 : index
    %15 = vector.load %arg2[%c2_14, %c0_15, %c0_16] : memref<9x16x16xf32, #tpu.memory_space<vmem>>, vector<1x16x16xf32>
    %16 = vector.shape_cast %15 : vector<1x16x16xf32> to vector<16x16xf32>
    %cst_17 = arith.constant dense<0.000000e+00> : vector<16x128xf32>
    %17 = tpu.matmul %16, %14, %cst_17 {dimension_numbers = #tpu.dot_dimension_numbers<[1], [0], [0], [1], [0, 0, 1, 1], [], []>} : vector<16x16xf32>, vector<16x128xf32>, vector<16x128xf32> -> vector<16x128xf32>
    %18 = arith.addf %12, %17 : vector<16x128xf32>
    %c0_18 = arith.constant 0 : index
    %c0_19 = arith.constant 0 : index
    %c10 = arith.constant 10 : index
    %19 = vector.load %arg1[%c0_18, %c0_19, %c10] : memref<1x16x256xf32, #tpu.memory_space<vmem>>, vector<1x16x128xf32>
    %20 = vector.shape_cast %19 : vector<1x16x128xf32> to vector<16x128xf32>
    %c3 = arith.constant 3 : index
    %c0_20 = arith.constant 0 : index
    %c0_21 = arith.constant 0 : index
    %21 = vector.load %arg2[%c3, %c0_20, %c0_21] : memref<9x16x16xf32, #tpu.memory_space<vmem>>, vector<1x16x16xf32>
    %22 = vector.shape_cast %21 : vector<1x16x16xf32> to vector<16x16xf32>
    %cst_22 = arith.constant dense<0.000000e+00> : vector<16x128xf32>
    %23 = tpu.matmul %22, %20, %cst_22 {dimension_numbers = #tpu.dot_dimension_numbers<[1], [0], [0], [1], [0, 0, 1, 1], [], []>} : vector<16x16xf32>, vector<16x128xf32>, vector<16x128xf32> -> vector<16x128xf32>
    %24 = arith.addf %18, %23 : vector<16x128xf32>
    %c0_23 = arith.constant 0 : index
    %c0_24 = arith.constant 0 : index
    %c11 = arith.constant 11 : index
    %25 = vector.load %arg1[%c0_23, %c0_24, %c11] : memref<1x16x256xf32, #tpu.memory_space<vmem>>, vector<1x16x128xf32>
    %26 = vector.shape_cast %25 : vector<1x16x128xf32> to vector<16x128xf32>
    %c4 = arith.constant 4 : index
    %c0_25 = arith.constant 0 : index
    %c0_26 = arith.constant 0 : index
    %27 = vector.load %arg2[%c4, %c0_25, %c0_26] : memref<9x16x16xf32, #tpu.memory_space<vmem>>, vector<1x16x16xf32>
    %28 = vector.shape_cast %27 : vector<1x16x16xf32> to vector<16x16xf32>
    %cst_27 = arith.constant dense<0.000000e+00> : vector<16x128xf32>
    %29 = tpu.matmul %28, %26, %cst_27 {dimension_numbers = #tpu.dot_dimension_numbers<[1], [0], [0], [1], [0, 0, 1, 1], [], []>} : vector<16x16xf32>, vector<16x128xf32>, vector<16x128xf32> -> vector<16x128xf32>
    %30 = arith.addf %24, %29 : vector<16x128xf32>
    %c0_28 = arith.constant 0 : index
    %c0_29 = arith.constant 0 : index
    %c12 = arith.constant 12 : index
    %31 = vector.load %arg1[%c0_28, %c0_29, %c12] : memref<1x16x256xf32, #tpu.memory_space<vmem>>, vector<1x16x128xf32>
    %32 = vector.shape_cast %31 : vector<1x16x128xf32> to vector<16x128xf32>
    %c5 = arith.constant 5 : index
    %c0_30 = arith.constant 0 : index
    %c0_31 = arith.constant 0 : index
    %33 = vector.load %arg2[%c5, %c0_30, %c0_31] : memref<9x16x16xf32, #tpu.memory_space<vmem>>, vector<1x16x16xf32>
    %34 = vector.shape_cast %33 : vector<1x16x16xf32> to vector<16x16xf32>
    %cst_32 = arith.constant dense<0.000000e+00> : vector<16x128xf32>
    %35 = tpu.matmul %34, %32, %cst_32 {dimension_numbers = #tpu.dot_dimension_numbers<[1], [0], [0], [1], [0, 0, 1, 1], [], []>} : vector<16x16xf32>, vector<16x128xf32>, vector<16x128xf32> -> vector<16x128xf32>
    %36 = arith.addf %30, %35 : vector<16x128xf32>
    %c0_33 = arith.constant 0 : index
    %c0_34 = arith.constant 0 : index
    %c20 = arith.constant 20 : index
    %37 = vector.load %arg1[%c0_33, %c0_34, %c20] : memref<1x16x256xf32, #tpu.memory_space<vmem>>, vector<1x16x128xf32>
    %38 = vector.shape_cast %37 : vector<1x16x128xf32> to vector<16x128xf32>
    %c6 = arith.constant 6 : index
    %c0_35 = arith.constant 0 : index
    %c0_36 = arith.constant 0 : index
    %39 = vector.load %arg2[%c6, %c0_35, %c0_36] : memref<9x16x16xf32, #tpu.memory_space<vmem>>, vector<1x16x16xf32>
    %40 = vector.shape_cast %39 : vector<1x16x16xf32> to vector<16x16xf32>
    %cst_37 = arith.constant dense<0.000000e+00> : vector<16x128xf32>
    %41 = tpu.matmul %40, %38, %cst_37 {dimension_numbers = #tpu.dot_dimension_numbers<[1], [0], [0], [1], [0, 0, 1, 1], [], []>} : vector<16x16xf32>, vector<16x128xf32>, vector<16x128xf32> -> vector<16x128xf32>
    %42 = arith.addf %36, %41 : vector<16x128xf32>
    %c0_38 = arith.constant 0 : index
    %c0_39 = arith.constant 0 : index
    %c21 = arith.constant 21 : index
    %43 = vector.load %arg1[%c0_38, %c0_39, %c21] : memref<1x16x256xf32, #tpu.memory_space<vmem>>, vector<1x16x128xf32>
    %44 = vector.shape_cast %43 : vector<1x16x128xf32> to vector<16x128xf32>
    %c7 = arith.constant 7 : index
    %c0_40 = arith.constant 0 : index
    %c0_41 = arith.constant 0 : index
    %45 = vector.load %arg2[%c7, %c0_40, %c0_41] : memref<9x16x16xf32, #tpu.memory_space<vmem>>, vector<1x16x16xf32>
    %46 = vector.shape_cast %45 : vector<1x16x16xf32> to vector<16x16xf32>
    %cst_42 = arith.constant dense<0.000000e+00> : vector<16x128xf32>
    %47 = tpu.matmul %46, %44, %cst_42 {dimension_numbers = #tpu.dot_dimension_numbers<[1], [0], [0], [1], [0, 0, 1, 1], [], []>} : vector<16x16xf32>, vector<16x128xf32>, vector<16x128xf32> -> vector<16x128xf32>
    %48 = arith.addf %42, %47 : vector<16x128xf32>
    %c0_43 = arith.constant 0 : index
    %c0_44 = arith.constant 0 : index
    %c22 = arith.constant 22 : index
    %49 = vector.load %arg1[%c0_43, %c0_44, %c22] : memref<1x16x256xf32, #tpu.memory_space<vmem>>, vector<1x16x128xf32>
    %50 = vector.shape_cast %49 : vector<1x16x128xf32> to vector<16x128xf32>
    %c8 = arith.constant 8 : index
    %c0_45 = arith.constant 0 : index
    %c0_46 = arith.constant 0 : index
    %51 = vector.load %arg2[%c8, %c0_45, %c0_46] : memref<9x16x16xf32, #tpu.memory_space<vmem>>, vector<1x16x16xf32>
    %52 = vector.shape_cast %51 : vector<1x16x16xf32> to vector<16x16xf32>
    %cst_47 = arith.constant dense<0.000000e+00> : vector<16x128xf32>
    %53 = tpu.matmul %52, %50, %cst_47 {dimension_numbers = #tpu.dot_dimension_numbers<[1], [0], [0], [1], [0, 0, 1, 1], [], []>} : vector<16x16xf32>, vector<16x128xf32>, vector<16x128xf32> -> vector<16x128xf32>
    %54 = arith.addf %48, %53 : vector<16x128xf32>
    %c0_48 = arith.constant 0 : index
    %c0_49 = arith.constant 0 : index
    %55 = vector.load %arg3[%c0_48, %c0_49] : memref<16x1xf32, #tpu.memory_space<vmem>>, vector<16x1xf32>
    %56 = vector.broadcast %55 : vector<16x1xf32> to vector<16x128xf32>
    %57 = arith.addf %54, %56 : vector<16x128xf32>
    %cst_50 = arith.constant 0.000000e+00 : f32
    %58 = vector.broadcast %cst_50 : f32 to vector<16x128xf32>
    %59 = arith.maximumf %57, %58 : vector<16x128xf32>
    %c0_51 = arith.constant 0 : index
    %c0_52 = arith.constant 0 : index
    %c11_53 = arith.constant 11 : index
    %60 = vector.load %arg1[%c0_51, %c0_52, %c11_53] : memref<1x16x256xf32, #tpu.memory_space<vmem>>, vector<1x16x128xf32>
    %61 = vector.shape_cast %60 : vector<1x16x128xf32> to vector<16x128xf32>
    %62 = arith.addf %59, %61 : vector<16x128xf32>
    %c0_54 = arith.constant 0 : index
    %c0_55 = arith.constant 0 : index
    %c0_56 = arith.constant 0 : index
    %63 = vector.load %arg4[%c0_54, %c0_55, %c0_56] : memref<1x16x128xf32, #tpu.memory_space<vmem>>, vector<1x16x128xf32>
    %64 = vector.shape_cast %63 : vector<1x16x128xf32> to vector<16x128xf32>
    %65 = vector.shape_cast %62 : vector<16x128xf32> to vector<1x16x128xf32>
    tpu.vector_store %arg4[%c0_54, %c0_55, %c0_56], %65 {strides = array<i32>} : memref<1x16x128xf32, #tpu.memory_space<vmem>>, vector<1x16x128xf32>,
    return
  }
  func.func @transform_0(%arg0: i32) -> (i32, i32, i32) {
    %c0_i32 = arith.constant 0 : i32
    %c0_i32_0 = arith.constant 0 : i32
    %c0_i32_1 = arith.constant 0 : i32
    return %arg0, %c0_i32, %c0_i32_0 : i32, i32, i32
  }
  func.func @transform_1(%arg0: i32) -> (i32, i32, i32) {
    %c0_i32 = arith.constant 0 : i32
    %c0_i32_0 = arith.constant 0 : i32
    %c0_i32_1 = arith.constant 0 : i32
    %c0_i32_2 = arith.constant 0 : i32
    return %c0_i32, %c0_i32_0, %c0_i32_1 : i32, i32, i32
  }
  func.func @transform_2(%arg0: i32) -> (i32, i32) {
    %c0_i32 = arith.constant 0 : i32
    %c0_i32_0 = arith.constant 0 : i32
    %c0_i32_1 = arith.constant 0 : i32
    return %c0_i32, %c0_i32_0 : i32, i32
  }
  func.func @transform_3(%arg0: i32) -> (i32, i32, i32) {
    %c0_i32 = arith.constant 0 : i32
    %c0_i32_0 = arith.constant 0 : i32
    %c0_i32_1 = arith.constant 0 : i32
    return %arg0, %c0_i32, %c0_i32_0 : i32, i32, i32
  }
}

</mosaic_0001>

<bundles_post_ra>
// kernel: encoder_forward.4
= control target key start
LH: loop header
LB: loop body
LE: loop exit
PB: predicated region body
PF: predicated region fallthrough
CT: control target
= control target key end

     0   :  { %s1985_s12 = smov 0   ;;  %s2167_s0 = inlined_call_operand.vmem [shape: f32[2,4,512], index: 0, kind: input, shape index: {}]   ;;  %s2168_s1 = inlined_call_operand.vmem [shape: f32[9,8,4], index: 1, kind: input, shape index: {}]   ;;  %s2169_s2 = inlined_call_operand.vmem [shape: f32[8,1], index: 2, kind: input, shape index: {}]   ;;  %s2170_s3 = inlined_call_operand.vmem [shape: f32[2,8,384], index: 3, kind: output, shape index: {}]  }
   0x1 LB: > { %s1780_s13 = sadd.s32 4294967295, %s1952_s12   ;;  %p1784_p0 = scmp.ge.s32.totalorder %s1952_s12, 1  ;;  %s1952_s12 = sphi %s1985_s12, %s13_s12  }
   0x2   : > { %p137_p1 = scmp.lt.s32.totalorder %s1952_s12, 3 }
   0x4   : > { %p138_p2 = pnand %p1784_p0, %p137_p1 }
   0x5   : > { %p161_p3 = scmp.lt.s32.totalorder (!%p138_p2), %s1780_s13, 1  ;;  %v1954_v0 = vmov (!%p138_p2), 0.0   ;;  %s1955_s18 = smov (!%p138_p2), 127   ;;  %vm1957_vm0 = vmmov (!%p138_p2), 0   ;;  %v1964_v5 = vmov (!%p138_p2), 0   ;;  %v1710_v6 = vld [vmem:[%s2169_s2] sm:$0xff] (!%p138_p2) }
   0x6   : > { %141 = sbr.rel (%p138_p2) target bundleno = 423 (0x1a7), region = 32  ;;  %269 = vmatprep.mubr.f32.mxu0 (!%p138_p2), %v1954_v0  ;;  %1862 = vmatprep.subr.mxu1 (!%p138_p2), %v1954_v0  ;;  %s1956_s19 = smov (!%p138_p2), 126   ;;  %vm190_vm1 = vcmask (!%p138_p2), 1039360   ;;  %vm198_vm2 = vcmask (!%p138_p2), 1043456   ;;  %v1788_v12 = vld [vmem:[%s2168_s1 + $0x8] sm:$0xff] (!%p138_p2)  ;;  %vm194_vm3 = vcmask (!%p138_p2), 31744  }
   0x7   : > { %1864 = vmatprep.mubr.msk.f32.mxu1 (!%p138_p2), %vm1957_vm0, %v1954_v0  ;;  %s1958_s20 = smov (!%p138_p2), 110   ;;  %s1959_s21 = smov (!%p138_p2), 109   ;;  %1943 = vset.pattern.permute.xlu0 (!%p138_p2), %v1964_v5  ;;  %vm515_vm4 = vcmask (!%p138_p2), 1031168   ;;  %vm688_vm5 = vcmask (!%p138_p2), 900096   ;;  %v173_v19 = vld [vmem:[%s2168_s1] sm:$0xff] (!%p138_p2)  ;;  %vm861_vm6 = vcmask (!%p138_p2), 891904  }
   0x8   : > { %s1960_s22 = smov (!%p138_p2), 108   ;;  %s1961_s23 = smov (!%p138_p2), 92   ;;  %v1799_v28 = vld [vmem:[%s2168_s1 + $0x10] sm:$0xff] (!%p138_p2)  ;;  %vm1034_vm7 = vcmask (!%p138_p2), 883712   ;;  %v1805_v36 = vld [vmem:[%s2168_s1 + $0x18] sm:$0xff] (!%p138_p2)  ;;  %v1811_v45 = vld [vmem:[%s2168_s1 + $0x20] sm:$0xff] (!%p138_p2) }
   0x9   : > { %s1962_s24 = smov (!%p138_p2), 91   ;;  %s1963_s25 = smov (!%p138_p2), 90   ;;  %vm1207_vm8 = vcmask (!%p138_p2), 752640   ;;  %v1817_v52 = vld [vmem:[%s2168_s1 + $0x28] sm:$0xff] (!%p138_p2)  ;;  %vm1380_vm9 = vcmask (!%p138_p2), 744448   ;;  %v1823_v58 = vld [vmem:[%s2168_s1 + $0x30] sm:$0xff] (!%p138_p2) }
   0xa   : > { %v1829_v63 = vld [vmem:[%s2168_s1 + $0x38] sm:$0xff] (!%p138_p2)  ;;  %vm1553_vm10 = vcmask (!%p138_p2), 736256  }
   0xd   : > { %s2172_s13 = smov (!%p161_p3, %s1780_s13), 1 }
   0xe   : > { %s1843_s14 = sshll.u32 %s2172_s13, 4 }
   0xf   : > { %s2001_s17 = scalar_lea.vmem %s2167_s0, %s1843_s14 }
  0x10   : > { %v2004_v1 = vld [vmem:[%s2001_s17] sm:$0xff]  ;;  %v175_v3 = vld [vmem:[%s2001_s17 + $0x8] sm:$0xff] }
  0x11   : > { %182 = vrot.lane.b32.xlu1 %v2004_v1, %s1955_s18  ;;  %v2009_v2 = vcombine.high %v2004_v1, %v2004_v1  ;;  %v181_v4 = vcombine.high %v175_v3, %v175_v3  ;;  %v172_v25 = vld [vmem:[%s2001_s17 + $0x8] sm:$0xf] }
  0x13   : > { %184 = vrot.lane.b32.xlu0 %v2009_v2, %s1955_s18 }
  0x15   : > { %507 = vrot.lane.b32.xlu1 %v2004_v1, %s1956_s19 }
  0x17   : > { %186 = vrot.lane.b32.xlu0 %v175_v3, %s1955_s18 }
  0x19   : > { %509 = vrot.lane.b32.xlu1 %v2009_v2, %s1956_s19 }
  0x1b   : > { %511 = vrot.lane.b32.xlu0 %v175_v3, %s1956_s19 }
  0x1d   : > { %684 = vrot.lane.b32.xlu1 %v175_v3, %s1958_s20 }
  0x1f   : > { %682 = vrot.lane.b32.xlu0 %v2009_v2, %s1958_s20 }
  0x21   : > { %188 = vrot.lane.b32.xlu1 %v181_v4, %s1955_s18 }
  0x23   : > { %680 = vrot.lane.b32.xlu0 %v2004_v1, %s1958_s20 }
  0x25   : > { %857 = vrot.lane.b32.xlu1 %v175_v3, %s1959_s21 }
  0x27   : > { %855 = vrot.lane.b32.xlu0 %v2009_v2, %s1959_s21 }
  0x29   : > { %513 = vrot.lane.b32.xlu1 %v181_v4, %s1956_s19 }
  0x2b   : > { %853 = vrot.lane.b32.xlu0 %v2004_v1, %s1959_s21 }
  0x2d   : > { %1030 = vrot.lane.b32.xlu1 %v175_v3, %s1960_s22 }
  0x2f   : > { %1028 = vrot.lane.b32.xlu0 %v2009_v2, %s1960_s22 }
  0x31   : > { %686 = vrot.lane.b32.xlu1 %v181_v4, %s1958_s20 }
  0x33   : > { %1026 = vrot.lane.b32.xlu0 %v2004_v1, %s1960_s22 }
  0x35   : > { %1201 = vrot.lane.b32.xlu1 %v2009_v2, %s1961_s23 }
  0x37   : > { %859 = vrot.lane.b32.xlu0 %v181_v4, %s1959_s21  ;;  %s1923_s21 = smul.u32 24, %s2172_s13 }
  0x39   : > { %1199 = vrot.lane.b32.xlu1 %v2004_v1, %s1961_s23 }
  0x3b   : > { %1203 = vrot.lane.b32.xlu0 %v175_v3, %s1961_s23 }
  0x3d   : > { %1205 = vrot.lane.b32.xlu1 %v181_v4, %s1961_s23 }
  0x3f   : > { %1032 = vrot.lane.b32.xlu0 %v181_v4, %s1960_s22 }
  0x41   : > { %1376 = vrot.lane.b32.xlu1 %v175_v3, %s1962_s24 }
  0x43   : > { %1374 = vrot.lane.b32.xlu0 %v2009_v2, %s1962_s24 }
  0x45   : > { %1378 = vrot.lane.b32.xlu1 %v181_v4, %s1962_s24 }
  0x47   : > { %1372 = vrot.lane.b32.xlu0 %v2004_v1, %s1962_s24  ;;  %s170_s24 = scalar_lea.vmem %s2170_s3, %s1923_s21 }
  0x49   : > { %1549 = vrot.lane.b32.xlu1 %v175_v3, %s1963_s25 }
  0x4b   : > { %1547 = vrot.lane.b32.xlu0 %v2009_v2, %s1963_s25 }
  0x4d   : > { %1545 = vrot.lane.b32.xlu1 %v2004_v1, %s1963_s25 }
  0x4f   : > { %1551 = vrot.lane.b32.xlu0 %v181_v4, %s1963_s25 }
  0x53   : > { %1713 = vperm.xlu0 %1943, %v1710_v6  }
  0x83   : > { %v183_v7 = vpop.permute.xlu1 %182 }
  0x85   : > { %v185_v8 = vpop.permute.xlu0 %184 }
  0x86   : > { %v191_v14 = vsel %vm190_vm1, %v183_v7, %v185_v8  ;;  %v1835_v7 = vld [vmem:[%s2168_s1 + $0x40] sm:$0xff] }
  0x87   : > { %v508_v9 = vpop.permute.xlu1 %507 }
  0x89   : > { %v187_v10 = vpop.permute.xlu0 %186 }
  0x8a   : > { %v192_v11 = vsel %vm190_vm1, %v185_v8, %v187_v10 }
  0x8b   : > { %v510_v13 = vpop.permute.xlu1 %509  ;;  %1789 = vmatprep.subr.msk.mxu0 %vm198_vm2, %v192_v11 }
  0x8c   : > { %1790 = vmatpush1.msk.msra.mxu0 %vm198_vm2, %v191_v14  ;;  %v516_v20 = vsel %vm515_vm4, %v508_v9, %v510_v13 }
  0x8d   : > { %1791 = vmatmul.mubr.msk.f32.vlgmr.msra.gmra.mrb[0].mxu0 %vm194_vm3, %v1788_v12  ;;  %v512_v15 = vpop.permute.xlu0 %511  ;;  %1794 = vmatprep.subr.msk.mxu0 %vm198_vm2, %v2009_v2 }
  0x8e   : > { %v517_v16 = vsel %vm515_vm4, %v510_v13, %v512_v15  ;;  %1795 = vmatpush1.msk.msra.mxu0 %vm198_vm2, %v2004_v1  ;;  %422 = vmatprep.mubr.f32.mxu0 %v1954_v0 }
  0x8f   : > { %v685_v17 = vpop.permute.xlu1 %684  ;;  %1800 = vmatprep.subr.msk.mxu0 %vm198_vm2, %v517_v16 }
  0x91   : > { %v683_v18 = vpop.permute.xlu0 %682 }
  0x92   : > { %v690_v22 = vsel %vm688_vm5, %v683_v18, %v685_v17 }
  0x93   : > { %v189_v21 = vpop.permute.xlu1 %188 }
  0x94   : > { %v193_v23 = vsel %vm190_vm1, %v187_v10, %v189_v21 }
  0x95   : > { %1863 = vmatpush3.msk.msra.mxu1 %vm198_vm2, %v193_v23  ;;  %v681_v24 = vpop.permute.xlu0 %680  ;;  %1796 = vmatmul.mubr.msk.f32.vlgmr.msra.gmra.mrb[0].mxu0 %vm194_vm3, %v173_v19 }
  0x96   : > { %1801 = vmatpush1.msk.msra.mxu0 %vm198_vm2, %v516_v20  ;;  %1865 = vmatmul.mubr.msk.f32.vlgmr.msra.gmra.mrb[0].mxu1 %vm194_vm3, %v1788_v12  ;;  %v689_v32 = vsel %vm688_vm5, %v681_v24, %v683_v18 }
  0x97   : > { %1806 = vmatprep.subr.msk.mxu0 %vm198_vm2, %v690_v22  ;;  %v858_v26 = vpop.permute.xlu1 %857  ;;  %1867 = vmatprep.subr.mxu1 %v1954_v0 }
  0x98   : > { %1868 = vmatpush3.msk.msra.mxu1 %vm198_vm2, %v172_v25  ;;  %1869 = vmatprep.mubr.msk.f32.mxu1 %vm1957_vm0, %v1954_v0 }
  0x99   : > { %v856_v27 = vpop.permute.xlu0 %855  ;;  %592 = vmatprep.mubr.f32.mxu0 %v1954_v0  ;;  %1872 = vmatprep.subr.mxu1 %v1954_v0 }
  0x9a   : > { %1870 = vmatmul.mubr.msk.f32.vlgmr.msra.gmra.mrb[2].mxu1 %vm194_vm3, %v173_v19  ;;  %v863_v30 = vsel %vm861_vm6, %v856_v27, %v858_v26 }
  0x9b   : > { %v514_v29 = vpop.permute.xlu1 %513  ;;  %1874 = vmatprep.mubr.msk.f32.mxu1 %vm1957_vm0, %v1954_v0 }
  0x9c   : > { %v518_v31 = vsel %vm515_vm4, %v512_v15, %v514_v29 }
  0x9d   : > { %v854_v33 = vpop.permute.xlu0 %853  ;;  %1802 = vmatmul.mubr.msk.f32.vlgmr.msra.gmra.mrb[0].mxu0 %vm194_vm3, %v1799_v28  ;;  %1873 = vmatpush3.msk.msra.mxu1 %vm198_vm2, %v518_v31 }
  0x9e   : > { %1807 = vmatpush1.msk.msra.mxu0 %vm198_vm2, %v689_v32  ;;  %765 = vmatprep.mubr.f32.mxu0 %v1954_v0  ;;  %v862_v40 = vsel %vm861_vm6, %v854_v33, %v856_v27 }
  0x9f   : > { %1812 = vmatprep.subr.msk.mxu0 %vm198_vm2, %v863_v30  ;;  %v1031_v34 = vpop.permute.xlu1 %1030  ;;  %1877 = vmatprep.subr.mxu1 %v1954_v0 }
  0xa0   : > { %1875 = vmatmul.mubr.msk.f32.vlgmr.msra.gmra.mrb[4].mxu1 %vm194_vm3, %v1799_v28 }
  0xa1   : > { %v1029_v35 = vpop.permute.xlu0 %1028  ;;  %1879 = vmatprep.mubr.msk.f32.mxu1 %vm1957_vm0, %v1954_v0 }
  0xa2   : > { %v1036_v38 = vsel %vm1034_vm7, %v1029_v35, %v1031_v34 }
  0xa3   : > { %v687_v37 = vpop.permute.xlu1 %686 }
  0xa4   : > { %v691_v39 = vsel %vm688_vm5, %v685_v17, %v687_v37 }
  0xa5   : > { %v1027_v41 = vpop.permute.xlu0 %1026  ;;  %1808 = vmatmul.mubr.msk.f32.vlgmr.msra.gmra.mrb[0].mxu0 %vm194_vm3, %v1805_v36  ;;  %1878 = vmatpush3.msk.msra.mxu1 %vm198_vm2, %v691_v39 }
  0xa6   : > { %1813 = vmatpush1.msk.msra.mxu0 %vm198_vm2, %v862_v40  ;;  %1882 = vmatprep.subr.mxu1 %v1954_v0  ;;  %v1035_v47 = vsel %vm1034_vm7, %v1027_v41, %v1029_v35 }
  0xa7   : > { %1818 = vmatprep.subr.msk.mxu0 %vm198_vm2, %v1036_v38  ;;  %v1202_v42 = vpop.permute.xlu1 %1201  ;;  %1880 = vmatmul.mubr.msk.f32.vlgmr.msra.gmra.mrb[6].mxu1 %vm194_vm3, %v1805_v36 }
  0xa8   : > { %938 = vmatprep.mubr.f32.mxu0 %v1954_v0  ;;  %1884 = vmatprep.mubr.msk.f32.mxu1 %vm1957_vm0, %v1954_v0 }
  0xa9   : > { %v860_v43 = vpop.permute.xlu0 %859 }
  0xaa   : > { %v864_v44 = vsel %vm861_vm6, %v858_v26, %v860_v43 }
  0xab   : > { %1883 = vmatpush3.msk.msra.mxu1 %vm198_vm2, %v864_v44  ;;  %v1200_v46 = vpop.permute.xlu1 %1199 }
  0xac   : > { %1885 = vmatmul.mubr.msk.f32.vlgmr.msra.gmra.mrb[8].mxu1 %vm194_vm3, %v1811_v45  ;;  %1887 = vmatprep.subr.mxu1 %v1954_v0  ;;  %v1208_v55 = vsel %vm1207_vm8, %v1200_v46, %v1202_v42 }
  0xad   : > { %v1204_v48 = vpop.permute.xlu0 %1203  ;;  %1814 = vmatmul.mubr.msk.f32.vlgmr.msra.gmra.mrb[0].mxu0 %vm194_vm3, %v1811_v45  ;;  %1889 = vmatprep.mubr.msk.f32.mxu1 %vm1957_vm0, %v1954_v0 }
  0xae   : > { %v1209_v49 = vsel %vm1207_vm8, %v1202_v42, %v1204_v48  ;;  %1819 = vmatpush1.msk.msra.mxu0 %vm198_vm2, %v1035_v47  ;;  %1111 = vmatprep.mubr.f32.mxu0 %v1954_v0 }
  0xaf   : > { %1824 = vmatprep.subr.msk.mxu0 %vm198_vm2, %v1209_v49  ;;  %v1206_v50 = vpop.permute.xlu1 %1205 }
  0xb0   : > { %v1210_v53 = vsel %vm1207_vm8, %v1204_v48, %v1206_v50 }
  0xb1   : > { %v1033_v51 = vpop.permute.xlu0 %1032 }
  0xb2   : > { %v1037_v54 = vsel %vm1034_vm7, %v1031_v34, %v1033_v51 }
  0xb3   : > { %1888 = vmatpush3.msk.msra.mxu1 %vm198_vm2, %v1037_v54  ;;  %v1377_v56 = vpop.permute.xlu1 %1376 }
  0xb4   : > { %1890 = vmatmul.mubr.msk.f32.vlgmr.msra.gmra.mrb[10].mxu1 %vm194_vm3, %v1817_v52  ;;  %1892 = vmatprep.subr.mxu1 %v1954_v0 }
  0xb5   : > { %v1375_v57 = vpop.permute.xlu0 %1374  ;;  %1820 = vmatmul.mubr.msk.f32.vlgmr.msra.gmra.mrb[0].mxu0 %vm194_vm3, %v1817_v52  ;;  %1893 = vmatpush3.msk.msra.mxu1 %vm198_vm2, %v1210_v53 }
  0xb6   : > { %v1382_v59 = vsel %vm1380_vm9, %v1375_v57, %v1377_v56  ;;  %1825 = vmatpush1.msk.msra.mxu0 %vm198_vm2, %v1208_v55  ;;  %1894 = vmatprep.mubr.msk.f32.mxu1 %vm1957_vm0, %v1954_v0 }
  0xb7   : > { %v1379_v60 = vpop.permute.xlu1 %1378  ;;  %1897 = vmatprep.subr.mxu1 %v1954_v0  ;;  %1830 = vmatprep.subr.msk.mxu0 %vm198_vm2, %v1382_v59 }
  0xb8   : > { %v1383_v61 = vsel %vm1380_vm9, %v1377_v56, %v1379_v60  ;;  %1895 = vmatmul.mubr.msk.f32.vlgmr.msra.gmra.mrb[12].mxu1 %vm194_vm3, %v1823_v58  ;;  %1284 = vmatprep.mubr.f32.mxu0 %v1954_v0 }
  0xb9   : > { %v1373_v62 = vpop.permute.xlu0 %1372  ;;  %1898 = vmatpush3.msk.msra.mxu1 %vm198_vm2, %v1383_v61  ;;  %1899 = vmatprep.mubr.msk.f32.mxu1 %vm1957_vm0, %v1954_v0 }
  0xba   : > { %1902 = vmatprep.subr.mxu1 %v1954_v0  ;;  %v1381_v1 = vsel %vm1380_vm9, %v1373_v62, %v1375_v57 }
  0xbb   : > { %v1550_v2 = vpop.permute.xlu1 %1549 }
  0xbc   : > { %1900 = vmatmul.mubr.msk.f32.vlgmr.msra.gmra.mrb[14].mxu1 %vm194_vm3, %v1829_v63 }
  0xbd   : > { %v1548_v3 = vpop.permute.xlu0 %1547  ;;  %1826 = vmatmul.mubr.msk.f32.vlgmr.msra.gmra.mrb[0].mxu0 %vm194_vm3, %v1823_v58  ;;  %1904 = vmatprep.mubr.msk.f32.mxu1 %vm1957_vm0, %v1954_v0 }
  0xbe   : > { %1831 = vmatpush1.msk.msra.mxu0 %vm198_vm2, %v1381_v1  ;;  %v1555_v4 = vsel %vm1553_vm10, %v1548_v3, %v1550_v2  ;;  %1457 = vmatprep.mubr.f32.mxu0 %v1954_v0 }
  0xbf   : > { %1836 = vmatprep.subr.msk.mxu0 %vm198_vm2, %v1555_v4  ;;  %v1546_v5 = vpop.permute.xlu1 %1545 }
  0xc0   : > { %v1554_v9 = vsel %vm1553_vm10, %v1546_v5, %v1548_v3 }
  0xc1   : > { %v1552_v6 = vpop.permute.xlu0 %1551 }
  0xc2   : > { %v1556_v8 = vsel %vm1553_vm10, %v1550_v2, %v1552_v6 }
  0xc3   : > { %1903 = vmatpush3.msk.msra.mxu1 %vm198_vm2, %v1556_v8 }
  0xc4   : > { %1905 = vmatmul.mubr.msk.f32.vlgmr.msra.gmra.mrb[16].mxu1 %vm194_vm3, %v1835_v7 }
  0xc5   : > { %1832 = vmatmul.mubr.msk.f32.vlgmr.msra.gmra.mrb[0].mxu0 %vm194_vm3, %v1829_v63 }
  0xc6   : > { %1837 = vmatpush1.msk.msra.mxu0 %vm198_vm2, %v1554_v9  ;;  %1630 = vmatprep.mubr.f32.mxu0 %v1954_v0 }
  0xcd   : > { %1838 = vmatmul.mubr.msk.f32.vlgmr.msra.gmra.mrb[0].mxu0 %vm194_vm3, %v1835_v7 }
  0xd2   : > { %v1714_v33 = vpop.permute.xlu0 %1713 }
 0x169   : > { %v342_v10 = vpop.f32.mrb[0].mxu1 }
 0x16a   : > { %v1866_v11 = vpop.f32.mrb[1].mxu1 }
 0x16d   : > { %v495_v12 = vpop.f32.mrb[2].mxu1 }
 0x16e   : > { %v496_v13 = vadd.f32 %v495_v12, %v342_v10  ;;  %v1871_v14 = vpop.f32.mrb[3].mxu1 }
 0x173   : > { %v665_v15 = vpop.f32.mrb[4].mxu1 }
 0x174   : > { %v671_v16 = vadd.f32 %v665_v15, %v496_v13  ;;  %v1876_v17 = vpop.f32.mrb[5].mxu1 }
 0x17a   : > { %v838_v18 = vpop.f32.mrb[6].mxu1 }
 0x17b   : > { %v844_v19 = vadd.f32 %v838_v18, %v671_v16  ;;  %v1881_v20 = vpop.f32.mrb[7].mxu1 }
 0x17f   : > { %v1011_v21 = vpop.f32.mrb[8].mxu1 }
 0x180   : > { %v1017_v22 = vadd.f32 %v1011_v21, %v844_v19  ;;  %v1886_v23 = vpop.f32.mrb[9].mxu1 }
 0x187   : > { %v1184_v24 = vpop.f32.mrb[10].mxu1 }
 0x188   : > { %v1190_v25 = vadd.f32 %v1184_v24, %v1017_v22  ;;  %v1891_v0 = vpop.f32.mrb[11].mxu1 }
 0x18b   : > { %v1357_v26 = vpop.f32.mrb[12].mxu1 }
 0x18c   : > { %v1363_v27 = vadd.f32 %v1357_v26, %v1190_v25  ;;  %v1896_v28 = vpop.f32.mrb[13].mxu1 }
 0x18f   : > { %v1530_v29 = vpop.f32.mrb[14].mxu1 }
 0x190   : > { %v1536_v30 = vadd.f32 %v1530_v29, %v1363_v27  ;;  %v1901_v31 = vpop.f32.mrb[15].mxu1 }
 0x197   : > { %v1703_v32 = vpop.f32.mrb[16].mxu1 }
 0x198   : > { %v1709_v34 = vadd.f32 %v1703_v32, %v1536_v30  ;;  %v1906_v35 = vpop.f32.mrb[17].mxu1 }
 0x19a   : > { %v1718_v36 = vadd.f32 %v1714_v33, %v1709_v34 }
 0x19c   : > { %v1721_v37 = vmax.f32 %v1718_v36, 0.0 }
 0x19e   : > { %1724 = vst [vmem:[%s170_s24 + $0x10] sm:$0xff] %v1721_v37 }
 0x1a0   : > { %v1632_v38 = vpop.f32.mrb[0].mxu0 }
 0x1a1   : > { %v1716_v39 = vadd.f32 %v1714_v33, %v1632_v38  ;;  %v1634_v40 = vpop.f32.mrb[1].mxu0 }
 0x1a2   : > { %v1717_v41 = vadd.f32 %v1714_v33, %v1634_v40 }
 0x1a3   : > { %v1719_v42 = vmax.f32 %v1716_v39, 0.0 }
 0x1a4   : > { %v1720_v43 = vmax.f32 %v1717_v41, 0.0 }
 0x1a5   : > { %1722 = vst [vmem:[%s170_s24] sm:$0xff] %v1719_v42 }
 0x1a6   : > { %1723 = vst [vmem:[%s170_s24 + $0x8] sm:$0xff] %v1720_v43 }
 0x1a7 PF: > { %s13_s12 = sadd.s32 1, %s1952_s12  }
 0x1a8   : > { %p10_p4 = scmp.ge.s32.totalorder %s13_s12, 4  }
 0x1aa   :  { %12 = sbr.rel (!%p10_p4) target bundleno = 1 (0x1), region = 70 }

// kernel: encoder_forward.5
= control target key start
LH: loop header
LB: loop body
LE: loop exit
PB: predicated region body
PF: predicated region fallthrough
CT: control target
= control target key end

     0   :  { %s1886_s12 = smov 0   ;;  %s2054_s0 = inlined_call_operand.vmem [shape: f32[2,8,512], index: 0, kind: input, shape index: {}]   ;;  %s2055_s1 = inlined_call_operand.vmem [shape: f32[9,8,8], index: 1, kind: input, shape index: {}]   ;;  %s2056_s2 = inlined_call_operand.vmem [shape: f32[8,1], index: 2, kind: input, shape index: {}]   ;;  %s2057_s3 = inlined_call_operand.vmem [shape: f32[2,8,384], index: 3, kind: output, shape index: {}]  }
   0x1 LB: > { %s1710_s13 = sadd.s32 4294967295, %s1853_s12   ;;  %p1714_p0 = scmp.ge.s32.totalorder %s1853_s12, 1  ;;  %s1853_s12 = sphi %s1886_s12, %s13_s12  }
   0x2   : > { %p137_p1 = scmp.lt.s32.totalorder %s1853_s12, 3 }
   0x4   : > { %p138_p2 = pnand %p1714_p0, %p137_p1 }
   0x5   : > { %p161_p3 = scmp.lt.s32.totalorder (!%p138_p2), %s1710_s13, 1  ;;  %v1855_v0 = vmov (!%p138_p2), 0.0   ;;  %s1856_s18 = smov (!%p138_p2), 127   ;;  %vm1858_vm0 = vmmov (!%p138_p2), 0   ;;  %v1865_v5 = vmov (!%p138_p2), 0   ;;  %v1637_v6 = vld [vmem:[%s2056_s2] sm:$0xff] (!%p138_p2) }
   0x6   : > { %141 = sbr.rel (%p138_p2) target bundleno = 423 (0x1a7), region = 32  ;;  %268 = vmatprep.mubr.f32.mxu0 (!%p138_p2), %v1855_v0  ;;  %1765 = vmatprep.subr.mxu1 (!%p138_p2), %v1855_v0  ;;  %s1857_s19 = smov (!%p138_p2), 126   ;;  %vm193_vm1 = vcmask (!%p138_p2), 1039360   ;;  %v1718_v12 = vld [vmem:[%s2055_s1 + $0x8] sm:$0xff] (!%p138_p2)  ;;  %vm200_vm2 = vcmask (!%p138_p2), 64512   ;;  %vm499_vm3 = vcmask (!%p138_p2), 1031168  }
   0x7   : > { %1767 = vmatprep.mubr.msk.f32.mxu1 (!%p138_p2), %vm1858_vm0, %v1855_v0  ;;  %s1859_s20 = smov (!%p138_p2), 110   ;;  %s1860_s21 = smov (!%p138_p2), 109   ;;  %1846 = vset.pattern.permute.xlu0 (!%p138_p2), %v1865_v5  ;;  %vm663_vm4 = vcmask (!%p138_p2), 900096   ;;  %v174_v19 = vld [vmem:[%s2055_s1] sm:$0xff] (!%p138_p2)  ;;  %vm827_vm5 = vcmask (!%p138_p2), 891904   ;;  %v1723_v27 = vld [vmem:[%s2055_s1 + $0x10] sm:$0xff] (!%p138_p2) }
   0x8   : > { %s1861_s22 = smov (!%p138_p2), 108   ;;  %s1862_s23 = smov (!%p138_p2), 92   ;;  %vm991_vm6 = vcmask (!%p138_p2), 883712   ;;  %v1726_v35 = vld [vmem:[%s2055_s1 + $0x18] sm:$0xff] (!%p138_p2)  ;;  %v1729_v44 = vld [vmem:[%s2055_s1 + $0x20] sm:$0xff] (!%p138_p2)  ;;  %vm1155_vm7 = vcmask (!%p138_p2), 752640  }
   0x9   : > { %s1863_s24 = smov (!%p138_p2), 91   ;;  %s1864_s25 = smov (!%p138_p2), 90   ;;  %v1732_v51 = vld [vmem:[%s2055_s1 + $0x28] sm:$0xff] (!%p138_p2)  ;;  %v1735_v57 = vld [vmem:[%s2055_s1 + $0x30] sm:$0xff] (!%p138_p2)  ;;  %vm1319_vm8 = vcmask (!%p138_p2), 744448   ;;  %v1738_v61 = vld [vmem:[%s2055_s1 + $0x38] sm:$0xff] (!%p138_p2) }
   0xa   : > { %vm1483_vm9 = vcmask (!%p138_p2), 736256  }
   0xd   : > { %s2059_s13 = smov (!%p161_p3, %s1710_s13), 1 }
   0xe   : > { %s1746_s14 = sshll.u32 %s2059_s13, 5 }
   0xf   : > { %s165_s17 = scalar_lea.vmem %s2054_s0, %s1746_s14 }
  0x10   : > { %v1902_v1 = vld [vmem:[%s165_s17 + $0x8] sm:$0xff]  ;;  %v1904_v2 = vld [vmem:[%s165_s17] sm:$0xff]  ;;  %v1908_v3 = vld [vmem:[%s165_s17 + $0x10] sm:$0xff] }
  0x11   : > { %187 = vrot.lane.b32.xlu0 %v1902_v1, %s1856_s18  ;;  %185 = vrot.lane.b32.xlu1 %v1904_v2, %s1856_s18  ;;  %v178_v4 = vld [vmem:[%s165_s17 + $0x18] sm:$0xff] }
  0x15   : > { %189 = vrot.lane.b32.xlu0 %v1908_v3, %s1856_s18  ;;  %493 = vrot.lane.b32.xlu1 %v1902_v1, %s1857_s19 }
  0x19   : > { %495 = vrot.lane.b32.xlu0 %v1908_v3, %s1857_s19  ;;  %491 = vrot.lane.b32.xlu1 %v1904_v2, %s1857_s19 }
  0x1d   : > { %657 = vrot.lane.b32.xlu0 %v1902_v1, %s1859_s20  ;;  %659 = vrot.lane.b32.xlu1 %v1908_v3, %s1859_s20 }
  0x21   : > { %655 = vrot.lane.b32.xlu0 %v1904_v2, %s1859_s20  ;;  %191 = vrot.lane.b32.xlu1 %v178_v4, %s1856_s18 }
  0x25   : > { %821 = vrot.lane.b32.xlu0 %v1902_v1, %s1860_s21  ;;  %823 = vrot.lane.b32.xlu1 %v1908_v3, %s1860_s21 }
  0x29   : > { %819 = vrot.lane.b32.xlu0 %v1904_v2, %s1860_s21  ;;  %497 = vrot.lane.b32.xlu1 %v178_v4, %s1857_s19 }
  0x2d   : > { %985 = vrot.lane.b32.xlu0 %v1902_v1, %s1861_s22  ;;  %987 = vrot.lane.b32.xlu1 %v1908_v3, %s1861_s22 }
  0x31   : > { %983 = vrot.lane.b32.xlu0 %v1904_v2, %s1861_s22  ;;  %661 = vrot.lane.b32.xlu1 %v178_v4, %s1859_s20 }
  0x35   : > { %825 = vrot.lane.b32.xlu0 %v178_v4, %s1860_s21  ;;  %1149 = vrot.lane.b32.xlu1 %v1902_v1, %s1862_s23  ;;  %s1826_s21 = smul.u32 24, %s2059_s13 }
  0x39   : > { %1151 = vrot.lane.b32.xlu0 %v1908_v3, %s1862_s23  ;;  %1147 = vrot.lane.b32.xlu1 %v1904_v2, %s1862_s23 }
  0x3d   : > { %989 = vrot.lane.b32.xlu0 %v178_v4, %s1861_s22  ;;  %1153 = vrot.lane.b32.xlu1 %v178_v4, %s1862_s23 }
  0x41   : > { %1313 = vrot.lane.b32.xlu0 %v1902_v1, %s1863_s24  ;;  %1315 = vrot.lane.b32.xlu1 %v1908_v3, %s1863_s24 }
  0x45   : > { %1311 = vrot.lane.b32.xlu0 %v1904_v2, %s1863_s24  ;;  %1317 = vrot.lane.b32.xlu1 %v178_v4, %s1863_s24  ;;  %s170_s24 = scalar_lea.vmem %s2057_s3, %s1826_s21 }
  0x49   : > { %1477 = vrot.lane.b32.xlu0 %v1902_v1, %s1864_s25  ;;  %1479 = vrot.lane.b32.xlu1 %v1908_v3, %s1864_s25 }
  0x4d   : > { %1481 = vrot.lane.b32.xlu0 %v178_v4, %s1864_s25  ;;  %1475 = vrot.lane.b32.xlu1 %v1904_v2, %s1864_s25 }
  0x51   : > { %1640 = vperm.xlu0 %1846, %v1637_v6   ;;  %v1741_v6 = vld [vmem:[%s2055_s1 + $0x40] sm:$0xff] }
  0x83   : > { %v188_v7 = vpop.permute.xlu0 %187  ;;  %v186_v8 = vpop.permute.xlu1 %185 }
  0x84   : > { %v194_v13 = vsel %vm193_vm1, %v186_v8, %v188_v7 }
  0x87   : > { %v190_v9 = vpop.permute.xlu0 %189  ;;  %v494_v10 = vpop.permute.xlu1 %493 }
  0x88   : > { %v195_v11 = vsel %vm193_vm1, %v188_v7, %v190_v9 }
  0x89   : > { %204 = vmatprep.subr.mxu0 %v195_v11 }
  0x8a   : > { %205 = vmatpush1.msra.mxu0 %v194_v13 }
  0x8b   : > { %v496_v14 = vpop.permute.xlu0 %495  ;;  %1719 = vmatmul.mubr.msk.f32.vlgmr.msra.gmra.mrb[0].mxu0 %vm200_vm2, %v1718_v12  ;;  %v492_v15 = vpop.permute.xlu1 %491  ;;  %348 = vmatprep.subr.mxu0 %v1902_v1 }
  0x8c   : > { %349 = vmatpush1.msra.mxu0 %v1904_v2  ;;  %v501_v16 = vsel %vm499_vm3, %v494_v10, %v496_v14  ;;  %412 = vmatprep.mubr.f32.mxu0 %v1855_v0  ;;  %v500_v20 = vsel %vm499_vm3, %v492_v15, %v494_v10 }
  0x8d   : > { %509 = vmatprep.subr.mxu0 %v501_v16 }
  0x8f   : > { %v658_v17 = vpop.permute.xlu0 %657  ;;  %v660_v18 = vpop.permute.xlu1 %659 }
  0x90   : > { %v665_v21 = vsel %vm663_vm4, %v658_v17, %v660_v18 }
  0x93   : > { %v656_v22 = vpop.permute.xlu0 %655  ;;  %v192_v23 = vpop.permute.xlu1 %191  ;;  %1721 = vmatmul.mubr.msk.f32.vlgmr.msra.gmra.mrb[0].mxu0 %vm200_vm2, %v174_v19 }
  0x94   : > { %510 = vmatpush1.msra.mxu0 %v500_v20  ;;  %v196_v24 = vsel %vm193_vm1, %v190_v9, %v192_v23  ;;  %573 = vmatprep.mubr.f32.mxu0 %v1855_v0  ;;  %v664_v29 = vsel %vm663_vm4, %v656_v22, %v658_v17 }
  0x95   : > { %673 = vmatprep.subr.mxu0 %v665_v21  ;;  %1766 = vmatpush3.msra.mxu1 %v196_v24 }
  0x96   : > { %1768 = vmatmul.mubr.msk.f32.vlgmr.msra.gmra.mrb[0].mxu1 %vm200_vm2, %v1718_v12  ;;  %1770 = vmatprep.subr.mxu1 %v1855_v0 }
  0x97   : > { %v822_v25 = vpop.permute.xlu0 %821  ;;  %v824_v26 = vpop.permute.xlu1 %823  ;;  %1771 = vmatpush3.msra.mxu1 %v1908_v3  ;;  %1772 = vmatprep.mubr.msk.f32.mxu1 %vm1858_vm0, %v1855_v0 }
  0x98   : > { %1775 = vmatprep.subr.mxu1 %v1855_v0  ;;  %v1965_v28 = vsel %vm827_vm5, %v822_v25, %v824_v26 }
  0x9a   : > { %1773 = vmatmul.mubr.msk.f32.vlgmr.msra.gmra.mrb[2].mxu1 %vm200_vm2, %v174_v19 }
  0x9b   : > { %v820_v30 = vpop.permute.xlu0 %819  ;;  %v498_v31 = vpop.permute.xlu1 %497  ;;  %1724 = vmatmul.mubr.msk.f32.vlgmr.msra.gmra.mrb[0].mxu0 %vm200_vm2, %v1723_v27  ;;  %1777 = vmatprep.mubr.msk.f32.mxu1 %vm1858_vm0, %v1855_v0 }
  0x9c   : > { %v502_v32 = vsel %vm499_vm3, %v496_v14, %v498_v31  ;;  %674 = vmatpush1.msra.mxu0 %v664_v29  ;;  %737 = vmatprep.mubr.f32.mxu0 %v1855_v0  ;;  %v1984_v37 = vsel %vm827_vm5, %v820_v30, %v822_v25 }
  0x9d   : > { %837 = vmatprep.subr.mxu0 %v1965_v28  ;;  %1776 = vmatpush3.msra.mxu1 %v502_v32 }
  0x9e   : > { %1780 = vmatprep.subr.mxu1 %v1855_v0  ;;  %1778 = vmatmul.mubr.msk.f32.vlgmr.msra.gmra.mrb[4].mxu1 %vm200_vm2, %v1723_v27 }
  0x9f   : > { %v986_v33 = vpop.permute.xlu0 %985  ;;  %v988_v34 = vpop.permute.xlu1 %987  ;;  %1782 = vmatprep.mubr.msk.f32.mxu1 %vm1858_vm0, %v1855_v0 }
  0xa0   : > { %v993_v36 = vsel %vm991_vm6, %v986_v33, %v988_v34 }
  0xa3   : > { %v984_v38 = vpop.permute.xlu0 %983  ;;  %v662_v39 = vpop.permute.xlu1 %661  ;;  %1727 = vmatmul.mubr.msk.f32.vlgmr.msra.gmra.mrb[0].mxu0 %vm200_vm2, %v1726_v35 }
  0xa4   : > { %v666_v40 = vsel %vm663_vm4, %v660_v18, %v662_v39  ;;  %838 = vmatpush1.msra.mxu0 %v1984_v37  ;;  %901 = vmatprep.mubr.f32.mxu0 %v1855_v0  ;;  %v992_v45 = vsel %vm991_vm6, %v984_v38, %v986_v33 }
  0xa5   : > { %1001 = vmatprep.subr.mxu0 %v993_v36  ;;  %1781 = vmatpush3.msra.mxu1 %v666_v40 }
  0xa6   : > { %1785 = vmatprep.subr.mxu1 %v1855_v0  ;;  %1783 = vmatmul.mubr.msk.f32.vlgmr.msra.gmra.mrb[6].mxu1 %vm200_vm2, %v1726_v35 }
  0xa7   : > { %v826_v41 = vpop.permute.xlu0 %825  ;;  %v1150_v42 = vpop.permute.xlu1 %1149  ;;  %1787 = vmatprep.mubr.msk.f32.mxu1 %vm1858_vm0, %v1855_v0 }
  0xa8   : > { %v1995_v43 = vsel %vm827_vm5, %v824_v26, %v826_v41 }
  0xa9   : > { %1786 = vmatpush3.msra.mxu1 %v1995_v43 }
  0xaa   : > { %1788 = vmatmul.mubr.msk.f32.vlgmr.msra.gmra.mrb[8].mxu1 %vm200_vm2, %v1729_v44  ;;  %1790 = vmatprep.subr.mxu1 %v1855_v0 }
  0xab   : > { %v1152_v46 = vpop.permute.xlu0 %1151  ;;  %v1148_v47 = vpop.permute.xlu1 %1147  ;;  %1730 = vmatmul.mubr.msk.f32.vlgmr.msra.gmra.mrb[0].mxu0 %vm200_vm2, %v1729_v44  ;;  %1792 = vmatprep.mubr.msk.f32.mxu1 %vm1858_vm0, %v1855_v0 }
  0xac   : > { %1002 = vmatpush1.msra.mxu0 %v992_v45  ;;  %v1157_v48 = vsel %vm1155_vm7, %v1150_v42, %v1152_v46  ;;  %1065 = vmatprep.mubr.f32.mxu0 %v1855_v0  ;;  %v1156_v54 = vsel %vm1155_vm7, %v1148_v47, %v1150_v42 }
  0xad   : > { %1165 = vmatprep.subr.mxu0 %v1157_v48 }
  0xaf   : > { %v990_v49 = vpop.permute.xlu0 %989  ;;  %v1154_v50 = vpop.permute.xlu1 %1153 }
  0xb0   : > { %v994_v52 = vsel %vm991_vm6, %v988_v34, %v990_v49  ;;  %v1158_v53 = vsel %vm1155_vm7, %v1152_v46, %v1154_v50 }
  0xb1   : > { %1791 = vmatpush3.msra.mxu1 %v994_v52 }
  0xb2   : > { %1793 = vmatmul.mubr.msk.f32.vlgmr.msra.gmra.mrb[10].mxu1 %vm200_vm2, %v1732_v51  ;;  %1795 = vmatprep.subr.mxu1 %v1855_v0 }
  0xb3   : > { %v1314_v55 = vpop.permute.xlu0 %1313  ;;  %v1316_v56 = vpop.permute.xlu1 %1315  ;;  %1733 = vmatmul.mubr.msk.f32.vlgmr.msra.gmra.mrb[0].mxu0 %vm200_vm2, %v1732_v51  ;;  %1796 = vmatpush3.msra.mxu1 %v1158_v53 }
  0xb4   : > { %1166 = vmatpush1.msra.mxu0 %v1156_v54  ;;  %1797 = vmatprep.mubr.msk.f32.mxu1 %vm1858_vm0, %v1855_v0  ;;  %v1321_v58 = vsel %vm1319_vm8, %v1314_v55, %v1316_v56 }
  0xb5   : > { %1329 = vmatprep.subr.mxu0 %v1321_v58  ;;  %1800 = vmatprep.subr.mxu1 %v1855_v0 }
  0xb6   : > { %1798 = vmatmul.mubr.msk.f32.vlgmr.msra.gmra.mrb[12].mxu1 %vm200_vm2, %v1735_v57  ;;  %1229 = vmatprep.mubr.f32.mxu0 %v1855_v0 }
  0xb7   : > { %v1312_v59 = vpop.permute.xlu0 %1311  ;;  %v1318_v60 = vpop.permute.xlu1 %1317  ;;  %1802 = vmatprep.mubr.msk.f32.mxu1 %vm1858_vm0, %v1855_v0 }
  0xb8   : > { %v1322_v62 = vsel %vm1319_vm8, %v1316_v56, %v1318_v60  ;;  %v1320_v63 = vsel %vm1319_vm8, %v1312_v59, %v1314_v55 }
  0xb9   : > { %1801 = vmatpush3.msra.mxu1 %v1322_v62 }
  0xba   : > { %1803 = vmatmul.mubr.msk.f32.vlgmr.msra.gmra.mrb[14].mxu1 %vm200_vm2, %v1738_v61  ;;  %1805 = vmatprep.subr.mxu1 %v1855_v0 }
  0xbb   : > { %v1478_v1 = vpop.permute.xlu0 %1477  ;;  %1736 = vmatmul.mubr.msk.f32.vlgmr.msra.gmra.mrb[0].mxu0 %vm200_vm2, %v1735_v57  ;;  %v1480_v2 = vpop.permute.xlu1 %1479  ;;  %1807 = vmatprep.mubr.msk.f32.mxu1 %vm1858_vm0, %v1855_v0 }
  0xbc   : > { %1330 = vmatpush1.msra.mxu0 %v1320_v63  ;;  %v1485_v3 = vsel %vm1483_vm9, %v1478_v1, %v1480_v2  ;;  %1393 = vmatprep.mubr.f32.mxu0 %v1855_v0 }
  0xbd   : > { %1493 = vmatprep.subr.mxu0 %v1485_v3 }
  0xbf   : > { %v1482_v4 = vpop.permute.xlu0 %1481  ;;  %v1476_v5 = vpop.permute.xlu1 %1475 }
  0xc0   : > { %v1486_v7 = vsel %vm1483_vm9, %v1480_v2, %v1482_v4  ;;  %v1484_v8 = vsel %vm1483_vm9, %v1476_v5, %v1478_v1 }
  0xc1   : > { %1806 = vmatpush3.msra.mxu1 %v1486_v7 }
  0xc2   : > { %1808 = vmatmul.mubr.msk.f32.vlgmr.msra.gmra.mrb[16].mxu1 %vm200_vm2, %v1741_v6 }
  0xc3   : > { %1739 = vmatmul.mubr.msk.f32.vlgmr.msra.gmra.mrb[0].mxu0 %vm200_vm2, %v1738_v61 }
  0xc4   : > { %1494 = vmatpush1.msra.mxu0 %v1484_v8  ;;  %1557 = vmatprep.mubr.f32.mxu0 %v1855_v0 }
  0xcb   : > { %1742 = vmatmul.mubr.msk.f32.vlgmr.msra.gmra.mrb[0].mxu0 %vm200_vm2, %v1741_v6 }
  0xd0   : > { %v1641_v33 = vpop.permute.xlu0 %1640 }
 0x169   : > { %v341_v9 = vpop.f32.mrb[0].mxu1 }
 0x16a   : > { %v1769_v10 = vpop.f32.mrb[1].mxu1 }
 0x16d   : > { %v485_v11 = vpop.f32.mrb[2].mxu1 }
 0x16e   : > { %v486_v12 = vadd.f32 %v485_v11, %v341_v9  ;;  %v1774_v13 = vpop.f32.mrb[3].mxu1 }
 0x171   : > { %v646_v14 = vpop.f32.mrb[4].mxu1 }
 0x172   : > { %v652_v15 = vadd.f32 %v646_v14, %v486_v12  ;;  %v1779_v16 = vpop.f32.mrb[5].mxu1 }
 0x179   : > { %v810_v17 = vpop.f32.mrb[6].mxu1 }
 0x17a   : > { %v816_v18 = vadd.f32 %v810_v17, %v652_v15  ;;  %v1784_v19 = vpop.f32.mrb[7].mxu1 }
 0x17d   : > { %v974_v20 = vpop.f32.mrb[8].mxu1 }
 0x17e   : > { %v980_v21 = vadd.f32 %v974_v20, %v816_v18  ;;  %v1789_v22 = vpop.f32.mrb[9].mxu1 }
 0x185   : > { %v1138_v23 = vpop.f32.mrb[10].mxu1 }
 0x186   : > { %v1144_v24 = vadd.f32 %v1138_v23, %v980_v21  ;;  %v1794_v0 = vpop.f32.mrb[11].mxu1 }
 0x189   : > { %v1302_v25 = vpop.f32.mrb[12].mxu1 }
 0x18a   : > { %v1308_v26 = vadd.f32 %v1302_v25, %v1144_v24  ;;  %v1799_v27 = vpop.f32.mrb[13].mxu1 }
 0x18d   : > { %v1466_v29 = vpop.f32.mrb[14].mxu1 }
 0x18e   : > { %v1472_v30 = vadd.f32 %v1466_v29, %v1308_v26  ;;  %v1804_v31 = vpop.f32.mrb[15].mxu1 }
 0x195   : > { %v1630_v32 = vpop.f32.mrb[16].mxu1 }
 0x196   : > { %v1636_v34 = vadd.f32 %v1630_v32, %v1472_v30  ;;  %v1809_v35 = vpop.f32.mrb[17].mxu1 }
 0x198   : > { %v1645_v36 = vadd.f32 %v1641_v33, %v1636_v34 }
 0x19a   : > { %v1648_v38 = vmax.f32 %v1645_v36, 0.0 }
 0x19c   : > { %v1651_v39 = vadd.f32 %v1648_v38, %v1995_v43 }
 0x19e   : > { %1654 = vst [vmem:[%s170_s24 + $0x10] sm:$0xff] %v1651_v39  ;;  %v1559_v40 = vpop.f32.mrb[0].mxu0 }
 0x19f   : > { %v1643_v41 = vadd.f32 %v1641_v33, %v1559_v40  ;;  %v1561_v42 = vpop.f32.mrb[1].mxu0 }
 0x1a0   : > { %v1644_v44 = vadd.f32 %v1641_v33, %v1561_v42 }
 0x1a1   : > { %v1646_v45 = vmax.f32 %v1643_v41, 0.0 }
 0x1a2   : > { %v1647_v46 = vmax.f32 %v1644_v44, 0.0 }
 0x1a3   : > { %v1649_v47 = vadd.f32 %v1646_v45, %v1984_v37 }
 0x1a4   : > { %v1650_v48 = vadd.f32 %v1647_v46, %v1965_v28 }
 0x1a5   : > { %1652 = vst [vmem:[%s170_s24] sm:$0xff] %v1649_v47 }
 0x1a6   : > { %1653 = vst [vmem:[%s170_s24 + $0x8] sm:$0xff] %v1650_v48 }
 0x1a7 PF: > { %s13_s12 = sadd.s32 1, %s1853_s12  }
 0x1a8   : > { %p10_p4 = scmp.ge.s32.totalorder %s13_s12, 4  }
 0x1aa   :  { %12 = sbr.rel (!%p10_p4) target bundleno = 1 (0x1), region = 70 }

// kernel: encoder_forward.6
= control target key start
LH: loop header
LB: loop body
LE: loop exit
PB: predicated region body
PF: predicated region fallthrough
CT: control target
= control target key end

     0   :  { %s1266_s12 = smov 0   ;;  %s1368_s0 = inlined_call_operand.vmem [shape: f32[2,8,256], index: 0, kind: input, shape index: {}]   ;;  %s1369_s1 = inlined_call_operand.vmem [shape: f32[9,16,8], index: 1, kind: input, shape index: {}]   ;;  %s1370_s2 = inlined_call_operand.vmem [shape: f32[16,1], index: 2, kind: input, shape index: {}]   ;;  %s1371_s3 = inlined_call_operand.vmem [shape: f32[2,16,128], index: 3, kind: output, shape index: {}]  }
   0x1 LB: > { %s1075_s13 = sadd.s32 4294967295, %s1235_s12   ;;  %p1079_p0 = scmp.ge.s32.totalorder %s1235_s12, 1  ;;  %s1235_s12 = sphi %s1266_s12, %s13_s12  }
   0x2   : > { %p137_p1 = scmp.lt.s32.totalorder %s1235_s12, 3 }
   0x4   : > { %p138_p2 = pnand %p1079_p0, %p137_p1 }
   0x5   : > { %p161_p3 = scmp.lt.s32.totalorder (!%p138_p2), %s1075_s13, 1  ;;  %v1084_v0 = vld [vmem:[%s1369_s1 + $0x10] sm:$0xff] (!%p138_p2)  ;;  %vm188_vm0 = vcmask (!%p138_p2), 64512   ;;  %v1098_v1 = vld [vmem:[%s1369_s1 + $0x40] sm:$0xff] (!%p138_p2)  ;;  %s1237_s22 = smov (!%p138_p2), 127   ;;  %v1244_v4 = vmov (!%p138_p2), 0  }
   0x6   : > { %141 = sbr.rel (%p138_p2) target bundleno = 391 (0x187), region = 32  ;;  %1151 = vmatprep.mubr.msk.f32.mxu1 (!%p138_p2), %vm188_vm0, %v1084_v0  ;;  %1171 = vmatprep.mubr.msk.f32.mxu0 (!%p138_p2), %vm188_vm0, %v1098_v1  ;;  %s1238_s23 = smov (!%p138_p2), 117   ;;  %v1003_v5 = vld [vmem:[%s1370_s2 + $0x8] sm:$0xff] (!%p138_p2)  ;;  %v1002_v6 = vld [vmem:[%s1370_s2] sm:$0xff] (!%p138_p2)  ;;  %vm185_vm1 = vcmask (!%p138_p2), 1039360   ;;  %vm544_vm2 = vcmask (!%p138_p2), 957440  }
   0x7   : > { %s1239_s24 = smov (!%p138_p2), 116   ;;  %s1240_s25 = smov (!%p138_p2), 108   ;;  %1228 = vset.pattern.permute.xlu1 (!%p138_p2), %v1244_v4  ;;  %1227 = vset.pattern.permute.xlu0 (!%p138_p2), %v1244_v4  ;;  %v1085_v13 = vld [vmem:[%s1369_s1 + $0x18] sm:$0xff] (!%p138_p2)  ;;  %v1099_v14 = vld [vmem:[%s1369_s1 + $0x48] sm:$0xff] (!%p138_p2)  ;;  %vm637_vm3 = vcmask (!%p138_p2), 949248   ;;  %v172_v15 = vld [vmem:[%s1369_s1] sm:$0xff] (!%p138_p2) }
   0x8   : > { %s1241_s26 = smov (!%p138_p2), 126   ;;  %s1242_s27 = smov (!%p138_p2), 107   ;;  %v1102_v16 = vld [vmem:[%s1369_s1 + $0x50] sm:$0xff] (!%p138_p2)  ;;  %vm730_vm4 = vcmask (!%p138_p2), 883712   ;;  %v173_v22 = vld [vmem:[%s1369_s1 + $0x8] sm:$0xff] (!%p138_p2)  ;;  %v1103_v23 = vld [vmem:[%s1369_s1 + $0x58] sm:$0xff] (!%p138_p2) }
   0x9   : > { %s1243_s28 = smov (!%p138_p2), 118   ;;  %s1245_s29 = smov (!%p138_p2), 106   ;;  %vm358_vm5 = vcmask (!%p138_p2), 1031168   ;;  %v1106_v25 = vld [vmem:[%s1369_s1 + $0x60] sm:$0xff] (!%p138_p2)  ;;  %vm823_vm6 = vcmask (!%p138_p2), 875520   ;;  %v1091_v32 = vld [vmem:[%s1369_s1 + $0x28] sm:$0xff] (!%p138_p2) }
   0xa   : > { %v1090_v26 = vld [vmem:[%s1369_s1 + $0x20] sm:$0xff] (!%p138_p2)  ;;  %v1107_v33 = vld [vmem:[%s1369_s1 + $0x68] sm:$0xff] (!%p138_p2)  ;;  %vm451_vm7 = vcmask (!%p138_p2), 965632   ;;  %v1110_v35 = vld [vmem:[%s1369_s1 + $0x70] sm:$0xff] (!%p138_p2)  ;;  %vm916_vm8 = vcmask (!%p138_p2), 867328  }
   0xb   : > { %v1094_v36 = vld [vmem:[%s1369_s1 + $0x30] sm:$0xff] (!%p138_p2)  ;;  %v1095_v42 = vld [vmem:[%s1369_s1 + $0x38] sm:$0xff] (!%p138_p2)  ;;  %v1114_v45 = vld [vmem:[%s1369_s1 + $0x80] sm:$0xff] (!%p138_p2) }
   0xc   : > { %v1111_v43 = vld [vmem:[%s1369_s1 + $0x78] sm:$0xff] (!%p138_p2)  ;;  %v1115_v46 = vld [vmem:[%s1369_s1 + $0x88] sm:$0xff] (!%p138_p2) }
   0xd   : > { %s1373_s13 = smov (!%p161_p3, %s1075_s13), 1 }
   0xe   : > { %s1120_s18 = sshll.u32 %s1373_s13, 4 }
   0xf   : > { %s165_s21 = scalar_lea.vmem %s1368_s0, %s1120_s18  ;;  %s170_s20 = scalar_lea.vmem %s1371_s3, %s1120_s18 }
  0x10   : > { %v174_v2 = vld [vmem:[%s165_s21] sm:$0xff]  ;;  %v175_v3 = vld [vmem:[%s165_s21 + $0x8] sm:$0xff] }
  0x11   : > { %181 = vrot.lane.b32.xlu1 %v174_v2, %s1237_s22  ;;  %540 = vrot.lane.b32.xlu0 %v174_v2, %s1238_s23 }
  0x15   : > { %183 = vrot.lane.b32.xlu1 %v175_v3, %s1237_s22  ;;  %542 = vrot.lane.b32.xlu0 %v175_v3, %s1238_s23 }
  0x19   : > { %635 = vrot.lane.b32.xlu1 %v175_v3, %s1239_s24  ;;  %633 = vrot.lane.b32.xlu0 %v174_v2, %s1239_s24 }
  0x1d   : > { %728 = vrot.lane.b32.xlu1 %v175_v3, %s1240_s25  ;;  %726 = vrot.lane.b32.xlu0 %v174_v2, %s1240_s25 }
  0x21   : > { %356 = vrot.lane.b32.xlu1 %v175_v3, %s1241_s26  ;;  %354 = vrot.lane.b32.xlu0 %v174_v2, %s1241_s26 }
  0x25   : > { %821 = vrot.lane.b32.xlu1 %v175_v3, %s1242_s27  ;;  %819 = vrot.lane.b32.xlu0 %v174_v2, %s1242_s27 }
  0x29   : > { %449 = vrot.lane.b32.xlu1 %v175_v3, %s1243_s28  ;;  %447 = vrot.lane.b32.xlu0 %v174_v2, %s1243_s28 }
  0x2d   : > { %914 = vrot.lane.b32.xlu1 %v175_v3, %s1245_s29  ;;  %912 = vrot.lane.b32.xlu0 %v174_v2, %s1245_s29 }
  0x31   : > { %1011 = vperm.xlu1 %1228, %v1003_v5   ;;  %1006 = vperm.xlu0 %1227, %v1002_v6  }
  0x83   : > { %v182_v7 = vpop.permute.xlu1 %181  ;;  %v541_v8 = vpop.permute.xlu0 %540 }
  0x87   : > { %v184_v9 = vpop.permute.xlu1 %183  ;;  %v543_v10 = vpop.permute.xlu0 %542 }
  0x88   : > { %v186_v11 = vsel %vm185_vm1, %v182_v7, %v184_v9  ;;  %v545_v12 = vsel %vm544_vm2, %v541_v8, %v543_v10 }
  0x89   : > { %1149 = vmatprep.subr.mxu1 %v186_v11  ;;  %1169 = vmatprep.subr.mxu0 %v545_v12 }
  0x8a   : > { %1150 = vmatpush3.msra.mxu1 %v186_v11  ;;  %1170 = vmatpush3.msra.mxu0 %v545_v12 }
  0x8b   : > { %1152 = vmatmul.mubr.msk.f32.vlgmr.msra.gmra.mrb[0].mxu1 %vm188_vm0, %v1085_v13  ;;  %v636_v17 = vpop.permute.xlu1 %635  ;;  %1172 = vmatmul.mubr.msk.f32.vlgmr.msra.gmra.mrb[0].mxu0 %vm188_vm0, %v1099_v14  ;;  %v634_v18 = vpop.permute.xlu0 %633 }
  0x8c   : > { %v638_v19 = vsel %vm637_vm3, %v634_v18, %v636_v17  ;;  %1154 = vmatprep.subr.mxu1 %v174_v2  ;;  %1156 = vmatprep.mubr.msk.f32.mxu1 %vm188_vm0, %v172_v15 }
  0x8d   : > { %1174 = vmatprep.subr.mxu0 %v638_v19  ;;  %1176 = vmatprep.mubr.msk.f32.mxu0 %vm188_vm0, %v1102_v16 }
  0x8e   : > { %1175 = vmatpush3.msra.mxu0 %v638_v19  ;;  %1155 = vmatpush3.msra.mxu1 %v174_v2 }
  0x8f   : > { %v729_v20 = vpop.permute.xlu1 %728  ;;  %v727_v21 = vpop.permute.xlu0 %726 }
  0x90   : > { %v731_v24 = vsel %vm730_vm4, %v727_v21, %v729_v20 }
  0x91   : > { %1179 = vmatprep.subr.mxu0 %v731_v24 }
  0x93   : > { %1157 = vmatmul.mubr.msk.f32.vlgmr.msra.gmra.mrb[0].mxu1 %vm188_vm0, %v173_v22  ;;  %1177 = vmatmul.mubr.msk.f32.vlgmr.msra.gmra.mrb[0].mxu0 %vm188_vm0, %v1103_v23  ;;  %v357_v27 = vpop.permute.xlu1 %356  ;;  %v355_v28 = vpop.permute.xlu0 %354 }
  0x94   : > { %1180 = vmatpush3.msra.mxu0 %v731_v24  ;;  %v359_v29 = vsel %vm358_vm5, %v355_v28, %v357_v27  ;;  %1181 = vmatprep.mubr.msk.f32.mxu0 %vm188_vm0, %v1106_v25 }
  0x95   : > { %1159 = vmatprep.subr.mxu1 %v359_v29  ;;  %1161 = vmatprep.mubr.msk.f32.mxu1 %vm188_vm0, %v1090_v26 }
  0x96   : > { %1160 = vmatpush3.msra.mxu1 %v359_v29 }
  0x97   : > { %v822_v30 = vpop.permute.xlu1 %821  ;;  %v820_v31 = vpop.permute.xlu0 %819 }
  0x98   : > { %v824_v34 = vsel %vm823_vm6, %v820_v31, %v822_v30 }
  0x99   : > { %1184 = vmatprep.subr.mxu0 %v824_v34 }
  0x9b   : > { %1162 = vmatmul.mubr.msk.f32.vlgmr.msra.gmra.mrb[0].mxu1 %vm188_vm0, %v1091_v32  ;;  %1182 = vmatmul.mubr.msk.f32.vlgmr.msra.gmra.mrb[0].mxu0 %vm188_vm0, %v1107_v33  ;;  %v450_v37 = vpop.permute.xlu1 %449  ;;  %v448_v38 = vpop.permute.xlu0 %447 }
  0x9c   : > { %1185 = vmatpush3.msra.mxu0 %v824_v34  ;;  %v452_v39 = vsel %vm451_vm7, %v448_v38, %v450_v37  ;;  %1186 = vmatprep.mubr.msk.f32.mxu0 %vm188_vm0, %v1110_v35 }
  0x9d   : > { %1164 = vmatprep.subr.mxu1 %v452_v39  ;;  %1166 = vmatprep.mubr.msk.f32.mxu1 %vm188_vm0, %v1094_v36 }
  0x9e   : > { %1165 = vmatpush3.msra.mxu1 %v452_v39 }
  0x9f   : > { %v915_v40 = vpop.permute.xlu1 %914  ;;  %v913_v41 = vpop.permute.xlu0 %912 }
  0xa0   : > { %v917_v44 = vsel %vm916_vm8, %v913_v41, %v915_v40 }
  0xa1   : > { %1189 = vmatprep.subr.mxu0 %v917_v44 }
  0xa3   : > { %1167 = vmatmul.mubr.msk.f32.vlgmr.msra.gmra.mrb[0].mxu1 %vm188_vm0, %v1095_v42  ;;  %1187 = vmatmul.mubr.msk.f32.vlgmr.msra.gmra.mrb[0].mxu0 %vm188_vm0, %v1111_v43 }
  0xa4   : > { %1190 = vmatpush3.msra.mxu0 %v917_v44  ;;  %1191 = vmatprep.mubr.msk.f32.mxu0 %vm188_vm0, %v1114_v45 }
  0xab   : > { %1192 = vmatmul.mubr.msk.f32.vlgmr.msra.gmra.mrb[0].mxu0 %vm188_vm0, %v1115_v46 }
  0xb0   : > { %v1012_v50 = vpop.permute.xlu1 %1011  ;;  %v1007_v53 = vpop.permute.xlu0 %1006 }
 0x176   : > { %v1168_v47 = vpop.f32.mrb[0].mxu1 }
 0x177   : > { %v526_v48 = vpop.f32.mrb[1].mxu1 }
 0x17e   : > { %v1193_v49 = vpop.f32.mrb[0].mxu0 }
 0x17f   : > { %v1194_v51 = vadd.f32 %v1193_v49, %v1168_v47  ;;  %v991_v52 = vpop.f32.mrb[1].mxu0 }
 0x180   : > { %v1195_v54 = vadd.f32 %v991_v52, %v526_v48 }
 0x181   : > { %v1015_v55 = vadd.f32 %v1194_v51, %v1012_v50 }
 0x182   : > { %v1014_v56 = vadd.f32 %v1195_v54, %v1007_v53 }
 0x183   : > { %v1017_v57 = vmax.f32 %v1015_v55, 0.0 }
 0x184   : > { %v1016_v58 = vmax.f32 %v1014_v56, 0.0 }
 0x185   : > { %1019 = vst [vmem:[%s170_s20 + $0x8] sm:$0xff] %v1017_v57 }
 0x186   : > { %1018 = vst [vmem:[%s170_s20] sm:$0xff] %v1016_v58 }
 0x187 PF: > { %s13_s12 = sadd.s32 1, %s1235_s12  }
 0x188   : > { %p10_p4 = scmp.ge.s32.totalorder %s13_s12, 4  }
 0x18a   :  { %12 = sbr.rel (!%p10_p4) target bundleno = 1 (0x1), region = 70 }

// kernel: encoder_forward.7
= control target key start
LH: loop header
LB: loop body
LE: loop exit
PB: predicated region body
PF: predicated region fallthrough
CT: control target
= control target key end

     0   :  { %s1454_s12 = smov 0   ;;  %s1565_s0 = inlined_call_operand.vmem [shape: f32[2,16,256], index: 0, kind: input, shape index: {}]   ;;  %s1566_s1 = inlined_call_operand.vmem [shape: f32[9,16,16], index: 1, kind: input, shape index: {}]   ;;  %s1567_s2 = inlined_call_operand.vmem [shape: f32[16,1], index: 2, kind: input, shape index: {}]   ;;  %s1568_s3 = inlined_call_operand.vmem [shape: f32[2,16,128], index: 3, kind: output, shape index: {}]  }
   0x1 LB: > { %s1130_s13 = sadd.s32 4294967295, %s1423_s12   ;;  %p1134_p0 = scmp.ge.s32.totalorder %s1423_s12, 1  ;;  %s1423_s12 = sphi %s1454_s12, %s13_s12  }
   0x2   : > { %p137_p1 = scmp.lt.s32.totalorder %s1423_s12, 3 }
   0x4   : > { %p138_p2 = pnand %p1134_p0, %p137_p1 }
   0x5   : > { %p161_p3 = scmp.lt.s32.totalorder (!%p138_p2), %s1130_s13, 1  ;;  %vm199_vm0 = vcmask (!%p138_p2), 130048   ;;  %v1153_v0 = vld [vmem:[%s1566_s1 + $0x40] sm:$0xff] (!%p138_p2)  ;;  %s1425_s20 = smov (!%p138_p2), 117   ;;  %v1139_v5 = vld [vmem:[%s1566_s1 + $0x10] sm:$0xff] (!%p138_p2)  ;;  %v1433_v9 = vmov (!%p138_p2), 0  }
   0x6   : > { %141 = sbr.rel (%p138_p2) target bundleno = 399 (0x18f), region = 32  ;;  %1245 = vmatprep.mubr.msk.f32.mxu0 (!%p138_p2), %vm199_vm0, %v1153_v0  ;;  %1217 = vmatprep.mubr.msk.f32.mxu1 (!%p138_p2), %vm199_vm0, %v1139_v5  ;;  %s1426_s23 = smov (!%p138_p2), 127   ;;  %v1056_v10 = vld [vmem:[%s1567_s2 + $0x8] sm:$0xff] (!%p138_p2)  ;;  %v1055_v11 = vld [vmem:[%s1567_s2] sm:$0xff] (!%p138_p2)  ;;  %vm571_vm1 = vcmask (!%p138_p2), 957440   ;;  %vm194_vm2 = vcmask (!%p138_p2), 1039360  }
   0x7   : > { %s1427_s24 = smov (!%p138_p2), 116   ;;  %s1428_s25 = smov (!%p138_p2), 108   ;;  %1416 = vset.pattern.permute.xlu1 (!%p138_p2), %v1433_v9  ;;  %1415 = vset.pattern.permute.xlu0 (!%p138_p2), %v1433_v9  ;;  %v1154_v25 = vld [vmem:[%s1566_s1 + $0x48] sm:$0xff] (!%p138_p2)  ;;  %v1157_v26 = vld [vmem:[%s1566_s1 + $0x50] sm:$0xff] (!%p138_p2)  ;;  %vm670_vm3 = vcmask (!%p138_p2), 949248   ;;  %v1140_v36 = vld [vmem:[%s1566_s1 + $0x18] sm:$0xff] (!%p138_p2) }
   0x8   : > { %s1429_s26 = smov (!%p138_p2), 126   ;;  %s1430_s27 = smov (!%p138_p2), 107   ;;  %vm769_vm4 = vcmask (!%p138_p2), 883712   ;;  %v173_v46 = vld [vmem:[%s1566_s1] sm:$0xff] (!%p138_p2)  ;;  %v1158_v47 = vld [vmem:[%s1566_s1 + $0x58] sm:$0xff] (!%p138_p2)  ;;  %vm373_vm5 = vcmask (!%p138_p2), 1031168  }
   0x9   : > { %s1431_s28 = smov (!%p138_p2), 118   ;;  %s1432_s29 = smov (!%p138_p2), 106   ;;  %v1161_v53 = vld [vmem:[%s1566_s1 + $0x60] sm:$0xff] (!%p138_p2)  ;;  %v174_v58 = vld [vmem:[%s1566_s1 + $0x8] sm:$0xff] (!%p138_p2)  ;;  %vm868_vm6 = vcmask (!%p138_p2), 875520   ;;  %vm472_vm7 = vcmask (!%p138_p2), 965632  }
   0xa   : > { %v1145_v0 = vld [vmem:[%s1566_s1 + $0x20] sm:$0xff] (!%p138_p2)  ;;  %v1162_v5 = vld [vmem:[%s1566_s1 + $0x68] sm:$0xff] (!%p138_p2)  ;;  %vm967_vm8 = vcmask (!%p138_p2), 867328  }
   0xd   : > { %s1570_s13 = smov (!%p161_p3, %s1130_s13), 1 }
   0xe   : > { %s1175_s14 = sshll.u32 %s1570_s13, 5  ;;  %s1176_s16 = sshll.u32 %s1570_s13, 4 }
   0xf   : > { %s165_s17 = scalar_lea.vmem %s1565_s0, %s1175_s14  ;;  %s170_s19 = scalar_lea.vmem %s1568_s3, %s1176_s16 }
  0x10   : > { %v177_v1 = vld [vmem:[%s165_s17 + $0x10] sm:$0xff]  ;;  %v175_v2 = vld [vmem:[%s165_s17] sm:$0xff]  ;;  %v178_v3 = vld [vmem:[%s165_s17 + $0x18] sm:$0xff] }
  0x11   : > { %567 = vrot.lane.b32.xlu1 %v177_v1, %s1425_s20  ;;  %563 = vrot.lane.b32.xlu0 %v175_v2, %s1425_s20  ;;  %v176_v4 = vld [vmem:[%s165_s17 + $0x8] sm:$0xff]  ;;  %v1350_v6 = vpack.i.bf16 %v178_v3, %v177_v1  ;;  %v1476_v8 = vpack.c.bf16 %v177_v1, %v175_v2 }
  0x12   : > { %v1345_v7 = vpack.i.bf16 %v176_v4, %v175_v2 }
  0x15   : > { %569 = vrot.lane.b32.xlu1 %v178_v3, %s1425_s20  ;;  %565 = vrot.lane.b32.xlu0 %v176_v4, %s1425_s20 }
  0x19   : > { %1351 = vrot.lane.b32.xlu1 %v1350_v6, %s1426_s23  ;;  %1346 = vrot.lane.b32.xlu0 %v1345_v7, %s1426_s23 }
  0x1d   : > { %1361 = vrot.lane.b32.xlu1 %v1350_v6, %s1427_s24  ;;  %1356 = vrot.lane.b32.xlu0 %v1345_v7, %s1427_s24 }
  0x21   : > { %1371 = vrot.lane.b32.xlu1 %v1350_v6, %s1428_s25  ;;  %1366 = vrot.lane.b32.xlu0 %v1345_v7, %s1428_s25 }
  0x25   : > { %1381 = vrot.lane.b32.xlu1 %v1350_v6, %s1429_s26  ;;  %1376 = vrot.lane.b32.xlu0 %v1345_v7, %s1429_s26 }
  0x29   : > { %1391 = vrot.lane.b32.xlu1 %v1350_v6, %s1430_s27  ;;  %1386 = vrot.lane.b32.xlu0 %v1345_v7, %s1430_s27 }
  0x2d   : > { %1401 = vrot.lane.b32.xlu1 %v1350_v6, %s1431_s28  ;;  %1396 = vrot.lane.b32.xlu0 %v1345_v7, %s1431_s28 }
  0x31   : > { %1411 = vrot.lane.b32.xlu1 %v1350_v6, %s1432_s29  ;;  %1406 = vrot.lane.b32.xlu0 %v1345_v7, %s1432_s29 }
  0x35   : > { %1064 = vperm.xlu1 %1416, %v1056_v10   ;;  %1059 = vperm.xlu0 %1415, %v1055_v11   ;;  %v1165_v11 = vld [vmem:[%s1566_s1 + $0x70] sm:$0xff] }
  0x83   : > { %v568_v12 = vpop.permute.xlu1 %567  ;;  %v564_v13 = vpop.permute.xlu0 %563 }
  0x87   : > { %v570_v14 = vpop.permute.xlu1 %569  ;;  %v566_v15 = vpop.permute.xlu0 %565 }
  0x88   : > { %v1484_v16 = vsel %vm571_vm1, %v568_v12, %v570_v14  ;;  %v1486_v17 = vsel %vm571_vm1, %v564_v13, %v566_v15 }
  0x89   : > { %v1292_v18 = vpack.c.bf16 %v1484_v16, %v1486_v17 }
  0x8b   : > { %v1352_v19 = vpop.permute.xlu1 %1351  ;;  %1293 = vmatprep.subr.bf16.mxu0 %v1292_v18  ;;  %v1347_v20 = vpop.permute.xlu0 %1346 }
  0x8c   : > { %v1354_v21 = vunpack.i.h.bf16 %v1352_v19  ;;  %v1353_v22 = vunpack.i.l.bf16 %v1352_v19  ;;  %v1349_v23 = vunpack.i.h.bf16 %v1347_v20  ;;  %v1348_v24 = vunpack.i.l.bf16 %v1347_v20  ;;  %1295 = vmatpush3.bf16.msra.mxu0 %v1292_v18  ;;  %v1146_v18 = vld [vmem:[%s1566_s1 + $0x28] sm:$0xff] }
  0x8e   : > { %v195_v27 = vsel %vm194_vm2, %v1348_v24, %v1349_v23  ;;  %v196_v28 = vsel %vm194_vm2, %v1353_v22, %v1354_v21  ;;  %v1149_v24 = vld [vmem:[%s1566_s1 + $0x30] sm:$0xff] }
  0x8f   : > { %v1362_v29 = vpop.permute.xlu1 %1361  ;;  %v1357_v30 = vpop.permute.xlu0 %1356  ;;  %v1276_v31 = vpack.c.bf16 %v196_v28, %v195_v27  ;;  %1246 = vmatmul.mubr.msk.f32.vlgmr.msra.gmra.mrb[0].mxu0 %vm199_vm0, %v1154_v25 }
  0x90   : > { %v1364_v32 = vunpack.i.h.bf16 %v1362_v29  ;;  %v1363_v33 = vunpack.i.l.bf16 %v1362_v29  ;;  %v1359_v34 = vunpack.i.h.bf16 %v1357_v30  ;;  %v1358_v35 = vunpack.i.l.bf16 %v1357_v30  ;;  %1252 = vmatprep.mubr.msk.f32.mxu0 %vm199_vm0, %v1157_v26  ;;  %v1166_v29 = vld [vmem:[%s1566_s1 + $0x78] sm:$0xff] }
  0x91   : > { %1277 = vmatprep.subr.bf16.mxu1 %v1276_v31 }
  0x92   : > { %1279 = vmatpush3.bf16.msra.mxu1 %v1276_v31  ;;  %v671_v37 = vsel %vm670_vm3, %v1358_v35, %v1359_v34  ;;  %v672_v38 = vsel %vm670_vm3, %v1363_v33, %v1364_v32  ;;  %v1169_v33 = vld [vmem:[%s1566_s1 + $0x80] sm:$0xff]  ;;  %v1150_v34 = vld [vmem:[%s1566_s1 + $0x38] sm:$0xff]  ;;  %v1170_v35 = vld [vmem:[%s1566_s1 + $0x88] sm:$0xff] }
  0x93   : > { %v1296_v39 = vpack.c.bf16 %v672_v38, %v671_v37  ;;  %v1372_v40 = vpop.permute.xlu1 %1371  ;;  %v1367_v41 = vpop.permute.xlu0 %1366  ;;  %1281 = vmatprep.subr.bf16.mxu1 %v1476_v8 }
  0x94   : > { %v1374_v42 = vunpack.i.h.bf16 %v1372_v40  ;;  %v1373_v43 = vunpack.i.l.bf16 %v1372_v40  ;;  %v1369_v44 = vunpack.i.h.bf16 %v1367_v41  ;;  %v1368_v45 = vunpack.i.l.bf16 %v1367_v41 }
  0x95   : > { %1218 = vmatmul.mubr.msk.f32.vlgmr.msra.gmra.mrb[0].mxu1 %vm199_vm0, %v1140_v36  ;;  %1297 = vmatprep.subr.bf16.mxu0 %v1296_v39 }
  0x96   : > { %1299 = vmatpush3.bf16.msra.mxu0 %v1296_v39  ;;  %1283 = vmatpush3.bf16.msra.mxu1 %v1476_v8  ;;  %v770_v48 = vsel %vm769_vm4, %v1368_v45, %v1369_v44  ;;  %v771_v49 = vsel %vm769_vm4, %v1373_v43, %v1374_v42 }
  0x97   : > { %v1382_v50 = vpop.permute.xlu1 %1381  ;;  %v1377_v51 = vpop.permute.xlu0 %1376  ;;  %1224 = vmatprep.mubr.msk.f32.mxu1 %vm199_vm0, %v173_v46  ;;  %v1300_v52 = vpack.c.bf16 %v771_v49, %v770_v48 }
  0x98   : > { %v1384_v54 = vunpack.i.h.bf16 %v1382_v50  ;;  %v1383_v55 = vunpack.i.l.bf16 %v1382_v50  ;;  %v1379_v56 = vunpack.i.h.bf16 %v1377_v51  ;;  %v1378_v57 = vunpack.i.l.bf16 %v1377_v51 }
  0x99   : > { %1253 = vmatmul.mubr.msk.f32.vlgmr.msra.gmra.mrb[0].mxu0 %vm199_vm0, %v1158_v47  ;;  %1301 = vmatprep.subr.bf16.mxu0 %v1300_v52 }
  0x9a   : > { %1303 = vmatpush3.bf16.msra.mxu0 %v1300_v52  ;;  %v374_v59 = vsel %vm373_vm5, %v1378_v57, %v1379_v56  ;;  %v375_v60 = vsel %vm373_vm5, %v1383_v55, %v1384_v54  ;;  %1259 = vmatprep.mubr.msk.f32.mxu0 %vm199_vm0, %v1161_v53 }
  0x9b   : > { %v1392_v61 = vpop.permute.xlu1 %1391  ;;  %v1387_v62 = vpop.permute.xlu0 %1386  ;;  %v1284_v63 = vpack.c.bf16 %v375_v60, %v374_v59 }
  0x9c   : > { %v1394_v1 = vunpack.i.h.bf16 %v1392_v61  ;;  %v1393_v2 = vunpack.i.l.bf16 %v1392_v61  ;;  %v1389_v3 = vunpack.i.h.bf16 %v1387_v62  ;;  %v1388_v4 = vunpack.i.l.bf16 %v1387_v62 }
  0x9d   : > { %1225 = vmatmul.mubr.msk.f32.vlgmr.msra.gmra.mrb[0].mxu1 %vm199_vm0, %v174_v58  ;;  %1285 = vmatprep.subr.bf16.mxu1 %v1284_v63 }
  0x9e   : > { %1287 = vmatpush3.bf16.msra.mxu1 %v1284_v63  ;;  %1231 = vmatprep.mubr.msk.f32.mxu1 %vm199_vm0, %v1145_v0  ;;  %v869_v6 = vsel %vm868_vm6, %v1388_v4, %v1389_v3  ;;  %v870_v7 = vsel %vm868_vm6, %v1393_v2, %v1394_v1 }
  0x9f   : > { %v1402_v8 = vpop.permute.xlu1 %1401  ;;  %v1397_v9 = vpop.permute.xlu0 %1396  ;;  %v1304_v10 = vpack.c.bf16 %v870_v7, %v869_v6 }
  0xa0   : > { %v1404_v12 = vunpack.i.h.bf16 %v1402_v8  ;;  %v1403_v13 = vunpack.i.l.bf16 %v1402_v8  ;;  %v1399_v14 = vunpack.i.h.bf16 %v1397_v9  ;;  %v1398_v15 = vunpack.i.l.bf16 %v1397_v9 }
  0xa1   : > { %1260 = vmatmul.mubr.msk.f32.vlgmr.msra.gmra.mrb[0].mxu0 %vm199_vm0, %v1162_v5  ;;  %1305 = vmatprep.subr.bf16.mxu0 %v1304_v10 }
  0xa2   : > { %1307 = vmatpush3.bf16.msra.mxu0 %v1304_v10  ;;  %v473_v19 = vsel %vm472_vm7, %v1398_v15, %v1399_v14  ;;  %v474_v20 = vsel %vm472_vm7, %v1403_v13, %v1404_v12  ;;  %1266 = vmatprep.mubr.msk.f32.mxu0 %vm199_vm0, %v1165_v11 }
  0xa3   : > { %v1412_v21 = vpop.permute.xlu1 %1411  ;;  %v1407_v22 = vpop.permute.xlu0 %1406  ;;  %v1288_v23 = vpack.c.bf16 %v474_v20, %v473_v19 }
  0xa4   : > { %v1414_v25 = vunpack.i.h.bf16 %v1412_v21  ;;  %v1413_v26 = vunpack.i.l.bf16 %v1412_v21  ;;  %v1409_v27 = vunpack.i.h.bf16 %v1407_v22  ;;  %v1408_v28 = vunpack.i.l.bf16 %v1407_v22 }
  0xa5   : > { %1232 = vmatmul.mubr.msk.f32.vlgmr.msra.gmra.mrb[0].mxu1 %vm199_vm0, %v1146_v18  ;;  %1289 = vmatprep.subr.bf16.mxu1 %v1288_v23 }
  0xa6   : > { %1291 = vmatpush3.bf16.msra.mxu1 %v1288_v23  ;;  %1238 = vmatprep.mubr.msk.f32.mxu1 %vm199_vm0, %v1149_v24  ;;  %v968_v30 = vsel %vm967_vm8, %v1408_v28, %v1409_v27  ;;  %v969_v31 = vsel %vm967_vm8, %v1413_v26, %v1414_v25 }
  0xa7   : > { %v1308_v32 = vpack.c.bf16 %v969_v31, %v968_v30 }
  0xa9   : > { %1267 = vmatmul.mubr.msk.f32.vlgmr.msra.gmra.mrb[0].mxu0 %vm199_vm0, %v1166_v29  ;;  %1309 = vmatprep.subr.bf16.mxu0 %v1308_v32 }
  0xaa   : > { %1311 = vmatpush3.bf16.msra.mxu0 %v1308_v32  ;;  %1273 = vmatprep.mubr.msk.f32.mxu0 %vm199_vm0, %v1169_v33 }
  0xad   : > { %1239 = vmatmul.mubr.msk.f32.vlgmr.msra.gmra.mrb[0].mxu1 %vm199_vm0, %v1150_v34 }
  0xb1   : > { %1274 = vmatmul.mubr.msk.f32.vlgmr.msra.gmra.mrb[0].mxu0 %vm199_vm0, %v1170_v35 }
  0xb4   : > { %v1065_v39 = vpop.permute.xlu1 %1064  ;;  %v1060_v42 = vpop.permute.xlu0 %1059 }
 0x180   : > { %v1240_v36 = vpop.f32.mrb[0].mxu1 }
 0x181   : > { %v549_v37 = vpop.f32.mrb[1].mxu1 }
 0x184   : > { %v1275_v38 = vpop.f32.mrb[0].mxu0 }
 0x185   : > { %v1312_v40 = vadd.f32 %v1275_v38, %v1240_v36  ;;  %v1044_v41 = vpop.f32.mrb[1].mxu0 }
 0x186   : > { %v1313_v43 = vadd.f32 %v1044_v41, %v549_v37 }
 0x187   : > { %v1068_v44 = vadd.f32 %v1312_v40, %v1065_v39 }
 0x188   : > { %v1067_v45 = vadd.f32 %v1313_v43, %v1060_v42 }
 0x189   : > { %v1070_v46 = vmax.f32 %v1068_v44, 0.0 }
 0x18a   : > { %v1069_v47 = vmax.f32 %v1067_v45, 0.0 }
 0x18b   : > { %v1072_v48 = vadd.f32 %v1070_v46, %v1484_v16 }
 0x18c   : > { %v1071_v49 = vadd.f32 %v1069_v47, %v1486_v17 }
 0x18d   : > { %1074 = vst [vmem:[%s170_s19 + $0x8] sm:$0xff] %v1072_v48 }
 0x18e   : > { %1073 = vst [vmem:[%s170_s19] sm:$0xff] %v1071_v49 }
 0x18f PF: > { %s13_s12 = sadd.s32 1, %s1423_s12  }
 0x190   : > { %p10_p4 = scmp.ge.s32.totalorder %s13_s12, 4  }
 0x192   :  { %12 = sbr.rel (!%p10_p4) target bundleno = 1 (0x1), region = 70 }

</bundles_post_ra>
